<compile_context>
chip_gen: v7x
topology: tpu7x:2x2x1
jax: 0.10.0
libtpu: 0.0.40
codegen_flags: <defaults>
</compile_context>

<pallas_src>
import math

import jax
import jax.numpy as jnp
import numpy as np
from jax.experimental import pallas as pl
from jax.experimental.pallas import tpu as pltpu

# ---------------- model hyper-parameters (small, consistent with module) ----
B = 2          # batch
S = 8          # sequence length
D = 32         # d_model ("size" of the EncoderLayer)
H = 4          # attention heads
DK = D // H    # per-head dim
DFF = 64       # feed-forward hidden dim
EPS = 1e-6


# ----------------------------- Pallas kernel --------------------------------
def encoder_layer_kernel(x_ref, mask_ref, wqkv_ref, bqkv_ref, wo_ref,
                         w1_ref, w2_ref, ln_ref, bmisc_ref, out_ref):
    f32 = jnp.float32
    x = x_ref[...].astype(f32)                      # (B*S, D)

    # ---- unpack packed parameter slabs (static, lane-0 aligned slices) ----
    ln1_a = ln_ref[0:1, :]                          # (1, D)
    ln1_b = ln_ref[1:2, :]
    ln2_a = ln_ref[2:3, :]
    ln2_b = ln_ref[3:4, :]
    b1 = bmisc_ref[0:1, :]                          # (1, DFF)
    bo = bmisc_ref[1:2, :D]                         # (1, D)
    b2 = bmisc_ref[2:3, :D]                         # (1, D)

    def layer_norm(v, a, b):
        # exact module semantics: unbiased std (n-1), eps added to std.
        mean = jnp.mean(v, axis=-1, keepdims=True)
        cen = v - mean
        var = jnp.sum(cen * cen, axis=-1, keepdims=True) * (1.0 / (D - 1))
        inv = pl.reciprocal(jnp.sqrt(var) + EPS, approx=False)
        return cen * (a * inv) + b                  # folded scale

    # additive mask bias, computed ONCE (hoisted out of the head/batch loops)
    mbias = jnp.where(mask_ref[...] == 0.0, f32(-1e9), f32(0.0))   # (B,S,S)

    # -------- sublayer 0: pre-norm + fused-QKV multi-head attention --------
    xn = layer_norm(x, ln1_a, ln1_b)
    qkv = jnp.dot(xn, wqkv_ref[...], preferred_element_type=f32) + bqkv_ref[...]
    q, k, v = qkv[:, :D], qkv[:, D:2 * D], qkv[:, 2 * D:]

    inv_sqrt_dk = 1.0 / math.sqrt(DK)
    attn_rows = []
    for bi in range(B):                             # static loop over batch
        rows = slice(bi * S, (bi + 1) * S)
        qh = q[rows].reshape(S, H, DK).swapaxes(0, 1)   # (H, S, DK)
        kh = k[rows].reshape(S, H, DK).swapaxes(0, 1)
        vh = v[rows].reshape(S, H, DK).swapaxes(0, 1)
        s = jnp.einsum('hqd,hkd->hqk', qh, kh, preferred_element_type=f32)
        s = s * inv_sqrt_dk + mbias[bi][None, :, :]
        m = jnp.max(s, axis=-1, keepdims=True)
        e = jnp.exp(s - m)
        p = e * pl.reciprocal(jnp.sum(e, axis=-1, keepdims=True), approx=False)
        o = jnp.einsum('hqk,hkd->hqd', p, vh, preferred_element_type=f32)
        attn_rows.append(o.swapaxes(0, 1).reshape(S, D))
    concat = jnp.concatenate(attn_rows, axis=0)     # (B*S, D)
    attn_out = jnp.dot(concat, wo_ref[...], preferred_element_type=f32) + bo
    x1 = x + attn_out                               # residual (dropout == id)

    # -------- sublayer 1: pre-norm + position-wise feed forward -------------
    x1n = layer_norm(x1, ln2_a, ln2_b)
    h1 = jnp.maximum(
        jnp.dot(x1n, w1_ref[...], preferred_element_type=f32) + b1, 0.0)
    h2 = jnp.dot(h1, w2_ref[...], preferred_element_type=f32) + b2

    out_ref[...] = (x1 + h2).astype(out_ref.dtype)


# ------------------------------ wrapper --------------------------------------
@jax.jit
def encoder_layer(x, mask, params):
    (ln1_a, ln1_b, wq, bq, wk, bk, wv, bv, wo, bo,
     ln2_a, ln2_b, w1, b1, w2, b2) = params
    b, s, d = x.shape
    x2d = x.reshape(b * s, d)                       # single slab of rows

    # ---- pack 16 small parameter arrays into 4 slabs (fewer DMAs) ----------
    wqkv = jnp.concatenate([wq, wk, wv], axis=1)                    # (D, 3D)
    bqkv = jnp.concatenate([bq, bk, bv], axis=1)                    # (1, 3D)
    ln_ab = jnp.concatenate([ln1_a, ln1_b, ln2_a, ln2_b], axis=0)   # (4, D)
    pad = jnp.zeros((1, DFF - d), jnp.float32)
    bmisc = jnp.concatenate(
        [b1,
         jnp.concatenate([bo, pad], axis=1),
         jnp.concatenate([b2, pad], axis=1)], axis=0)               # (3, DFF)

    vmem = pl.BlockSpec(memory_space=pltpu.MemorySpace.VMEM)
    out2d = pl.pallas_call(
        encoder_layer_kernel,
        out_shape=jax.ShapeDtypeStruct((b * s, d), x.dtype),
        in_specs=[vmem] * 9,          # whole arrays, single invocation
        out_specs=vmem,
    )(x2d, mask, wqkv, bqkv, wo, w1, w2, ln_ab, bmisc)
    return out2d.reshape(b, s, d)


# ---------------------- pure-JAX reference (for checking) --------------------
def ref_encoder_layer(x, mask, params):
    (ln1_a, ln1_b, wq, bq, wk, bk, wv, bv, wo, bo,
     ln2_a, ln2_b, w1, b1, w2, b2) = params

    def layer_norm(v, a, b):
        mean = jnp.mean(v, axis=-1, keepdims=True)
        var = jnp.sum((v - mean) ** 2, axis=-1, keepdims=True) / (v.shape[-1] - 1)
        std = jnp.sqrt(var)
        return a[0] * (v - mean) / (std + EPS) + b[0]

    def one(xb, mb):
        xn = layer_norm(xb, ln1_a, ln1_b)
        q = xn @ wq + bq[0]
        k = xn @ wk + bk[0]
        v = xn @ wv + bv[0]
        outs = []
        for hi in range(H):
            sl = slice(hi * DK, (hi + 1) * DK)
            sc = (q[:, sl] @ k[:, sl].T) / math.sqrt(DK)
            sc = jnp.where(mb == 0, -1e9, sc)
            p = jax.nn.softmax(sc, axis=-1)
            outs.append(p @ v[:, sl])
        attn = jnp.concatenate(outs, -1) @ wo + bo[0]
        x1 = xb + attn
        x1n = layer_norm(x1, ln2_a, ln2_b)
        h = jnp.maximum(x1n @ w1 + b1[0], 0.0)
        return x1 + (h @ w2 + b2[0])

    return jax.vmap(one)(x, mask)


# ------------------------------- main ----------------------------------------
if __name__ == "__main__":
    key = jax.random.PRNGKey(0)
    keys = jax.random.split(key, 12)

    def lin(k, fan_in, fan_out):
        w = jax.random.normal(k, (fan_in, fan_out), jnp.float32) / math.sqrt(fan_in)
        b = jnp.zeros((1, fan_out), jnp.float32)
        return w, b

    wq, bq = lin(keys[0], D, D)
    wk, bk = lin(keys[1], D, D)
    wv, bv = lin(keys[2], D, D)
    wo, bo = lin(keys[3], D, D)
    w1, b1 = lin(keys[4], D, DFF)
    w2, b2 = lin(keys[5], DFF, D)
    ln1_a = jnp.ones((1, D), jnp.float32)
    ln1_b = jnp.zeros((1, D), jnp.float32)
    ln2_a = jnp.ones((1, D), jnp.float32)
    ln2_b = jnp.zeros((1, D), jnp.float32)

    params = (ln1_a, ln1_b, wq, bq, wk, bk, wv, bv, wo, bo,
              ln2_a, ln2_b, w1, b1, w2, b2)

    x = jax.random.normal(keys[6], (B, S, D), jnp.float32)

    # mask: [B, S, S]; batch 0 sees all keys, batch 1 masks out last 2 keys
    lengths = jnp.array([S, S - 2], jnp.int32)
    key_idx = jnp.arange(S)[None, None, :]                 # (1,1,S)
    mask = (key_idx < lengths[:, None, None]).astype(jnp.float32)
    mask = jnp.broadcast_to(mask, (B, S, S))

    out = encoder_layer(x, mask, params)
    out = jax.block_until_ready(out)

    ref = ref_encoder_layer(x, mask, params)
    np.testing.assert_allclose(np.asarray(out), np.asarray(ref),
                               rtol=2e-4, atol=2e-4)

    print("KERNEL_OK")
</pallas_src>

<mosaic_0001>
module attributes {stable_mosaic.version = 11 : i64} {
  func.func @encoder_layer_kernel(%arg0: memref<16x32xf32, #tpu.memory_space<vmem>>, %arg1: memref<2x8x8xf32, #tpu.memory_space<vmem>>, %arg2: memref<32x96xf32, #tpu.memory_space<vmem>>, %arg3: memref<1x96xf32, #tpu.memory_space<vmem>>, %arg4: memref<32x32xf32, #tpu.memory_space<vmem>>, %arg5: memref<32x64xf32, #tpu.memory_space<vmem>>, %arg6: memref<64x32xf32, #tpu.memory_space<vmem>>, %arg7: memref<4x32xf32, #tpu.memory_space<vmem>>, %arg8: memref<3x64xf32, #tpu.memory_space<vmem>>, %arg9: memref<16x32xf32, #tpu.memory_space<vmem>>) attributes {dimension_semantics = [], scalar_prefetch = 0 : i64, scratch_operands = 0 : i64, tpu.core_type = #tpu.core_type<tc>} {
    %c0 = arith.constant 0 : index
    %c0_0 = arith.constant 0 : index
    %0 = vector.load %arg0[%c0, %c0_0] : memref<16x32xf32, #tpu.memory_space<vmem>>, vector<16x32xf32>
    %c0_1 = arith.constant 0 : index
    %c0_2 = arith.constant 0 : index
    %1 = vector.load %arg7[%c0_1, %c0_2] : memref<4x32xf32, #tpu.memory_space<vmem>>, vector<1x32xf32>
    %c1 = arith.constant 1 : index
    %c0_3 = arith.constant 0 : index
    %2 = vector.load %arg7[%c1, %c0_3] : memref<4x32xf32, #tpu.memory_space<vmem>>, vector<1x32xf32>
    %c2 = arith.constant 2 : index
    %c0_4 = arith.constant 0 : index
    %3 = vector.load %arg7[%c2, %c0_4] : memref<4x32xf32, #tpu.memory_space<vmem>>, vector<1x32xf32>
    %c3 = arith.constant 3 : index
    %c0_5 = arith.constant 0 : index
    %4 = vector.load %arg7[%c3, %c0_5] : memref<4x32xf32, #tpu.memory_space<vmem>>, vector<1x32xf32>
    %c0_6 = arith.constant 0 : index
    %c0_7 = arith.constant 0 : index
    %5 = vector.load %arg8[%c0_6, %c0_7] : memref<3x64xf32, #tpu.memory_space<vmem>>, vector<1x64xf32>
    %c1_8 = arith.constant 1 : index
    %c0_9 = arith.constant 0 : index
    %6 = vector.load %arg8[%c1_8, %c0_9] : memref<3x64xf32, #tpu.memory_space<vmem>>, vector<1x32xf32>
    %c2_10 = arith.constant 2 : index
    %c0_11 = arith.constant 0 : index
    %7 = vector.load %arg8[%c2_10, %c0_11] : memref<3x64xf32, #tpu.memory_space<vmem>>, vector<1x32xf32>
    %c0_12 = arith.constant 0 : index
    %c0_13 = arith.constant 0 : index
    %c0_14 = arith.constant 0 : index
    %8 = vector.load %arg1[%c0_12, %c0_13, %c0_14] : memref<2x8x8xf32, #tpu.memory_space<vmem>>, vector<2x8x8xf32>
    %cst = arith.constant 0.000000e+00 : f32
    %9 = vector.broadcast %cst : f32 to vector<2x8x8xf32>
    %10 = arith.cmpf oeq, %8, %9 : vector<2x8x8xf32>
    %cst_15 = arith.constant -1.000000e+09 : f32
    %cst_16 = arith.constant 0.000000e+00 : f32
    %11 = vector.broadcast %cst_15 : f32 to vector<2x8x8xf32>
    %12 = vector.broadcast %cst_16 : f32 to vector<2x8x8xf32>
    %13 = arith.select %10, %11, %12 : vector<2x8x8xi1>, vector<2x8x8xf32>
    %cst_17 = arith.constant dense<0.000000e+00> : vector<16xf32>
    %14 = vector.multi_reduction <add>, %0, %cst_17 [1] : vector<16x32xf32> to vector<16xf32>
    %15 = vector.shape_cast %14 : vector<16xf32> to vector<16x1xf32>
    %cst_18 = arith.constant 3.200000e+01 : f32
    %16 = vector.broadcast %cst_18 : f32 to vector<16x1xf32>
    %17 = arith.divf %15, %16 : vector<16x1xf32>
    %18 = vector.broadcast %17 : vector<16x1xf32> to vector<16x32xf32>
    %19 = arith.subf %0, %18 : vector<16x32xf32>
    %20 = arith.mulf %19, %19 : vector<16x32xf32>
    %cst_19 = arith.constant dense<0.000000e+00> : vector<16xf32>
    %21 = vector.multi_reduction <add>, %20, %cst_19 [1] : vector<16x32xf32> to vector<16xf32>
    %22 = vector.shape_cast %21 : vector<16xf32> to vector<16x1xf32>
    %cst_20 = arith.constant 0.0322580636 : f32
    %23 = vector.broadcast %cst_20 : f32 to vector<16x1xf32>
    %24 = arith.mulf %22, %23 : vector<16x1xf32>
    %25 = math.sqrt %24 : vector<16x1xf32>
    %cst_21 = arith.constant 9.99999997E-7 : f32
    %26 = vector.broadcast %cst_21 : f32 to vector<16x1xf32>
    %27 = arith.addf %25, %26 : vector<16x1xf32>
    %28 = tpu.reciprocal %27 : vector<16x1xf32> -> vector<16x1xf32>
    %29 = vector.broadcast %1 : vector<1x32xf32> to vector<16x32xf32>
    %30 = vector.broadcast %28 : vector<16x1xf32> to vector<16x32xf32>
    %31 = arith.mulf %29, %30 : vector<16x32xf32>
    %32 = arith.mulf %19, %31 : vector<16x32xf32>
    %33 = vector.broadcast %2 : vector<1x32xf32> to vector<16x32xf32>
    %34 = arith.addf %32, %33 : vector<16x32xf32>
    %c0_22 = arith.constant 0 : index
    %c0_23 = arith.constant 0 : index
    %35 = vector.load %arg2[%c0_22, %c0_23] : memref<32x96xf32, #tpu.memory_space<vmem>>, vector<32x96xf32>
    %cst_24 = arith.constant dense<0.000000e+00> : vector<16x96xf32>
    %36 = tpu.matmul %34, %35, %cst_24 {dimension_numbers = #tpu.dot_dimension_numbers<[1], [0], [0], [1], [0, 0, 1, 1], [], []>} : vector<16x32xf32>, vector<32x96xf32>, vector<16x96xf32> -> vector<16x96xf32>
    %c0_25 = arith.constant 0 : index
    %c0_26 = arith.constant 0 : index
    %37 = vector.load %arg3[%c0_25, %c0_26] : memref<1x96xf32, #tpu.memory_space<vmem>>, vector<1x96xf32>
    %38 = vector.broadcast %37 : vector<1x96xf32> to vector<16x96xf32>
    %39 = arith.addf %36, %38 : vector<16x96xf32>
    %40 = vector.extract_strided_slice %39 {offsets = [0, 0], sizes = [16, 32], strides = [1, 1]} : vector<16x96xf32> to vector<16x32xf32>
    %41 = vector.extract_strided_slice %39 {offsets = [0, 32], sizes = [16, 32], strides = [1, 1]} : vector<16x96xf32> to vector<16x32xf32>
    %42 = vector.extract_strided_slice %39 {offsets = [0, 64], sizes = [16, 32], strides = [1, 1]} : vector<16x96xf32> to vector<16x32xf32>
    %43 = vector.extract_strided_slice %40 {offsets = [0, 0], sizes = [8, 32], strides = [1, 1]} : vector<16x32xf32> to vector<8x32xf32>
    %44 = vector.shape_cast %43 : vector<8x32xf32> to vector<8x4x8xf32>
    %45 = tpu.transpose %44, [1, 0, 2] : vector<8x4x8xf32> -> vector<4x8x8xf32>
    %46 = vector.extract_strided_slice %41 {offsets = [0, 0], sizes = [8, 32], strides = [1, 1]} : vector<16x32xf32> to vector<8x32xf32>
    %47 = vector.shape_cast %46 : vector<8x32xf32> to vector<8x4x8xf32>
    %48 = tpu.transpose %47, [1, 0, 2] : vector<8x4x8xf32> -> vector<4x8x8xf32>
    %49 = vector.extract_strided_slice %42 {offsets = [0, 0], sizes = [8, 32], strides = [1, 1]} : vector<16x32xf32> to vector<8x32xf32>
    %50 = vector.shape_cast %49 : vector<8x32xf32> to vector<8x4x8xf32>
    %51 = tpu.transpose %50, [1, 0, 2] : vector<8x4x8xf32> -> vector<4x8x8xf32>
    "tpu.trace_start"() <{level = 10 : i32, message = "hqd,hkd->hqk"}> : () -> ()
    %cst_27 = arith.constant dense<0.000000e+00> : vector<4x8x8xf32>
    %52 = tpu.matmul %45, %48, %cst_27 {dimension_numbers = #tpu.dot_dimension_numbers<[2], [2], [1], [1], [0, 0, 0, 1, 1, 1], [0], [0]>} : vector<4x8x8xf32>, vector<4x8x8xf32>, vector<4x8x8xf32> -> vector<4x8x8xf32>
    "tpu.trace_stop"() : () -> ()
    %cst_28 = arith.constant 0.353553385 : f32
    %53 = vector.broadcast %cst_28 : f32 to vector<4x8x8xf32>
    %54 = arith.mulf %52, %53 : vector<4x8x8xf32>
    %55 = vector.extract_strided_slice %13 {offsets = [0, 0, 0], sizes = [1, 8, 8], strides = [1, 1, 1]} : vector<2x8x8xf32> to vector<1x8x8xf32>
    %56 = vector.shape_cast %55 : vector<1x8x8xf32> to vector<8x8xf32>
    %57 = vector.shape_cast %56 : vector<8x8xf32> to vector<1x8x8xf32>
    %58 = vector.broadcast %57 : vector<1x8x8xf32> to vector<4x8x8xf32>
    %59 = arith.addf %54, %58 : vector<4x8x8xf32>
    %cst_29 = arith.constant dense<0xFF800000> : vector<4x8xf32>
    %60 = vector.multi_reduction <maximumf>, %59, %cst_29 [2] : vector<4x8x8xf32> to vector<4x8xf32>
    %61 = vector.shape_cast %60 : vector<4x8xf32> to vector<4x8x1xf32>
    %62 = vector.broadcast %61 : vector<4x8x1xf32> to vector<4x8x8xf32>
    %63 = arith.subf %59, %62 : vector<4x8x8xf32>
    %64 = math.exp %63 : vector<4x8x8xf32>
    %cst_30 = arith.constant dense<0.000000e+00> : vector<4x8xf32>
    %65 = vector.multi_reduction <add>, %64, %cst_30 [2] : vector<4x8x8xf32> to vector<4x8xf32>
    %66 = vector.shape_cast %65 : vector<4x8xf32> to vector<4x8x1xf32>
    %67 = tpu.reciprocal %66 : vector<4x8x1xf32> -> vector<4x8x1xf32>
    %68 = vector.broadcast %67 : vector<4x8x1xf32> to vector<4x8x8xf32>
    %69 = arith.mulf %64, %68 : vector<4x8x8xf32>
    "tpu.trace_start"() <{level = 10 : i32, message = "hqk,hkd->hqd"}> : () -> ()
    %cst_31 = arith.constant dense<0.000000e+00> : vector<4x8x8xf32>
    %70 = tpu.matmul %69, %51, %cst_31 {dimension_numbers = #tpu.dot_dimension_numbers<[2], [1], [1], [2], [0, 0, 0, 1, 1, 2], [0], [0]>} : vector<4x8x8xf32>, vector<4x8x8xf32>, vector<4x8x8xf32> -> vector<4x8x8xf32>
    "tpu.trace_stop"() : () -> ()
    %71 = tpu.transpose %70, [1, 0, 2] : vector<4x8x8xf32> -> vector<8x4x8xf32>
    %72 = vector.shape_cast %71 : vector<8x4x8xf32> to vector<8x32xf32>
    %73 = vector.extract_strided_slice %40 {offsets = [8, 0], sizes = [8, 32], strides = [1, 1]} : vector<16x32xf32> to vector<8x32xf32>
    %74 = vector.shape_cast %73 : vector<8x32xf32> to vector<8x4x8xf32>
    %75 = tpu.transpose %74, [1, 0, 2] : vector<8x4x8xf32> -> vector<4x8x8xf32>
    %76 = vector.extract_strided_slice %41 {offsets = [8, 0], sizes = [8, 32], strides = [1, 1]} : vector<16x32xf32> to vector<8x32xf32>
    %77 = vector.shape_cast %76 : vector<8x32xf32> to vector<8x4x8xf32>
    %78 = tpu.transpose %77, [1, 0, 2] : vector<8x4x8xf32> -> vector<4x8x8xf32>
    %79 = vector.extract_strided_slice %42 {offsets = [8, 0], sizes = [8, 32], strides = [1, 1]} : vector<16x32xf32> to vector<8x32xf32>
    %80 = vector.shape_cast %79 : vector<8x32xf32> to vector<8x4x8xf32>
    %81 = tpu.transpose %80, [1, 0, 2] : vector<8x4x8xf32> -> vector<4x8x8xf32>
    "tpu.trace_start"() <{level = 10 : i32, message = "hqd,hkd->hqk"}> : () -> ()
    %cst_32 = arith.constant dense<0.000000e+00> : vector<4x8x8xf32>
    %82 = tpu.matmul %75, %78, %cst_32 {dimension_numbers = #tpu.dot_dimension_numbers<[2], [2], [1], [1], [0, 0, 0, 1, 1, 1], [0], [0]>} : vector<4x8x8xf32>, vector<4x8x8xf32>, vector<4x8x8xf32> -> vector<4x8x8xf32>
    "tpu.trace_stop"() : () -> ()
    %cst_33 = arith.constant 0.353553385 : f32
    %83 = vector.broadcast %cst_33 : f32 to vector<4x8x8xf32>
    %84 = arith.mulf %82, %83 : vector<4x8x8xf32>
    %85 = vector.extract_strided_slice %13 {offsets = [1, 0, 0], sizes = [1, 8, 8], strides = [1, 1, 1]} : vector<2x8x8xf32> to vector<1x8x8xf32>
    %86 = vector.shape_cast %85 : vector<1x8x8xf32> to vector<8x8xf32>
    %87 = vector.shape_cast %86 : vector<8x8xf32> to vector<1x8x8xf32>
    %88 = vector.broadcast %87 : vector<1x8x8xf32> to vector<4x8x8xf32>
    %89 = arith.addf %84, %88 : vector<4x8x8xf32>
    %cst_34 = arith.constant dense<0xFF800000> : vector<4x8xf32>
    %90 = vector.multi_reduction <maximumf>, %89, %cst_34 [2] : vector<4x8x8xf32> to vector<4x8xf32>
    %91 = vector.shape_cast %90 : vector<4x8xf32> to vector<4x8x1xf32>
    %92 = vector.broadcast %91 : vector<4x8x1xf32> to vector<4x8x8xf32>
    %93 = arith.subf %89, %92 : vector<4x8x8xf32>
    %94 = math.exp %93 : vector<4x8x8xf32>
    %cst_35 = arith.constant dense<0.000000e+00> : vector<4x8xf32>
    %95 = vector.multi_reduction <add>, %94, %cst_35 [2] : vector<4x8x8xf32> to vector<4x8xf32>
    %96 = vector.shape_cast %95 : vector<4x8xf32> to vector<4x8x1xf32>
    %97 = tpu.reciprocal %96 : vector<4x8x1xf32> -> vector<4x8x1xf32>
    %98 = vector.broadcast %97 : vector<4x8x1xf32> to vector<4x8x8xf32>
    %99 = arith.mulf %94, %98 : vector<4x8x8xf32>
    "tpu.trace_start"() <{level = 10 : i32, message = "hqk,hkd->hqd"}> : () -> ()
    %cst_36 = arith.constant dense<0.000000e+00> : vector<4x8x8xf32>
    %100 = tpu.matmul %99, %81, %cst_36 {dimension_numbers = #tpu.dot_dimension_numbers<[2], [1], [1], [2], [0, 0, 0, 1, 1, 2], [0], [0]>} : vector<4x8x8xf32>, vector<4x8x8xf32>, vector<4x8x8xf32> -> vector<4x8x8xf32>
    "tpu.trace_stop"() : () -> ()
    %101 = tpu.transpose %100, [1, 0, 2] : vector<4x8x8xf32> -> vector<8x4x8xf32>
    %102 = vector.shape_cast %101 : vector<8x4x8xf32> to vector<8x32xf32>
    %103 = tpu.concatenate %72, %102 in 0 : vector<8x32xf32>, vector<8x32xf32> -> vector<16x32xf32>
    %c0_37 = arith.constant 0 : index
    %c0_38 = arith.constant 0 : index
    %104 = vector.load %arg4[%c0_37, %c0_38] : memref<32x32xf32, #tpu.memory_space<vmem>>, vector<32x32xf32>
    %cst_39 = arith.constant dense<0.000000e+00> : vector<16x32xf32>
    %105 = tpu.matmul %103, %104, %cst_39 {dimension_numbers = #tpu.dot_dimension_numbers<[1], [0], [0], [1], [0, 0, 1, 1], [], []>} : vector<16x32xf32>, vector<32x32xf32>, vector<16x32xf32> -> vector<16x32xf32>
    %106 = vector.broadcast %6 : vector<1x32xf32> to vector<16x32xf32>
    %107 = arith.addf %105, %106 : vector<16x32xf32>
    %108 = arith.addf %0, %107 : vector<16x32xf32>
    %cst_40 = arith.constant dense<0.000000e+00> : vector<16xf32>
    %109 = vector.multi_reduction <add>, %108, %cst_40 [1] : vector<16x32xf32> to vector<16xf32>
    %110 = vector.shape_cast %109 : vector<16xf32> to vector<16x1xf32>
    %cst_41 = arith.constant 3.200000e+01 : f32
    %111 = vector.broadcast %cst_41 : f32 to vector<16x1xf32>
    %112 = arith.divf %110, %111 : vector<16x1xf32>
    %113 = vector.broadcast %112 : vector<16x1xf32> to vector<16x32xf32>
    %114 = arith.subf %108, %113 : vector<16x32xf32>
    %115 = arith.mulf %114, %114 : vector<16x32xf32>
    %cst_42 = arith.constant dense<0.000000e+00> : vector<16xf32>
    %116 = vector.multi_reduction <add>, %115, %cst_42 [1] : vector<16x32xf32> to vector<16xf32>
    %117 = vector.shape_cast %116 : vector<16xf32> to vector<16x1xf32>
    %cst_43 = arith.constant 0.0322580636 : f32
    %118 = vector.broadcast %cst_43 : f32 to vector<16x1xf32>
    %119 = arith.mulf %117, %118 : vector<16x1xf32>
    %120 = math.sqrt %119 : vector<16x1xf32>
    %cst_44 = arith.constant 9.99999997E-7 : f32
    %121 = vector.broadcast %cst_44 : f32 to vector<16x1xf32>
    %122 = arith.addf %120, %121 : vector<16x1xf32>
    %123 = tpu.reciprocal %122 : vector<16x1xf32> -> vector<16x1xf32>
    %124 = vector.broadcast %3 : vector<1x32xf32> to vector<16x32xf32>
    %125 = vector.broadcast %123 : vector<16x1xf32> to vector<16x32xf32>
    %126 = arith.mulf %124, %125 : vector<16x32xf32>
    %127 = arith.mulf %114, %126 : vector<16x32xf32>
    %128 = vector.broadcast %4 : vector<1x32xf32> to vector<16x32xf32>
    %129 = arith.addf %127, %128 : vector<16x32xf32>
    %c0_45 = arith.constant 0 : index
    %c0_46 = arith.constant 0 : index
    %130 = vector.load %arg5[%c0_45, %c0_46] : memref<32x64xf32, #tpu.memory_space<vmem>>, vector<32x64xf32>
    %cst_47 = arith.constant dense<0.000000e+00> : vector<16x64xf32>
    %131 = tpu.matmul %129, %130, %cst_47 {dimension_numbers = #tpu.dot_dimension_numbers<[1], [0], [0], [1], [0, 0, 1, 1], [], []>} : vector<16x32xf32>, vector<32x64xf32>, vector<16x64xf32> -> vector<16x64xf32>
    %132 = vector.broadcast %5 : vector<1x64xf32> to vector<16x64xf32>
    %133 = arith.addf %131, %132 : vector<16x64xf32>
    %cst_48 = arith.constant 0.000000e+00 : f32
    %134 = vector.broadcast %cst_48 : f32 to vector<16x64xf32>
    %135 = arith.maximumf %133, %134 : vector<16x64xf32>
    %c0_49 = arith.constant 0 : index
    %c0_50 = arith.constant 0 : index
    %136 = vector.load %arg6[%c0_49, %c0_50] : memref<64x32xf32, #tpu.memory_space<vmem>>, vector<64x32xf32>
    %cst_51 = arith.constant dense<0.000000e+00> : vector<16x32xf32>
    %137 = tpu.matmul %135, %136, %cst_51 {dimension_numbers = #tpu.dot_dimension_numbers<[1], [0], [0], [1], [0, 0, 1, 1], [], []>} : vector<16x64xf32>, vector<64x32xf32>, vector<16x32xf32> -> vector<16x32xf32>
    %138 = vector.broadcast %7 : vector<1x32xf32> to vector<16x32xf32>
    %139 = arith.addf %137, %138 : vector<16x32xf32>
    %140 = arith.addf %108, %139 : vector<16x32xf32>
    %c0_52 = arith.constant 0 : index
    %c0_53 = arith.constant 0 : index
    %141 = vector.load %arg9[%c0_52, %c0_53] : memref<16x32xf32, #tpu.memory_space<vmem>>, vector<16x32xf32>
    tpu.vector_store %arg9[%c0_52, %c0_53], %140 {strides = array<i32>} : memref<16x32xf32, #tpu.memory_space<vmem>>, vector<16x32xf32>,
    return
  }
}

</mosaic_0001>

<bundles_post_ra>
// kernel: encoder_layer.1
= control target key start
LH: loop header
LB: loop body
LE: loop exit
PB: predicated region body
PF: predicated region fallthrough
CT: control target
= control target key end

     0   :  { %vm48_vm0 = vcmask 261120   ;;  %s3973_s0 = inlined_call_operand.vmem [shape: f32[16,32], index: 0, kind: input, shape index: {}]   ;;  %s3974_s1 = inlined_call_operand.vmem [shape: f32[2,8,8], index: 1, kind: input, shape index: {}]   ;;  %s3975_s2 = inlined_call_operand.vmem [shape: f32[32,96], index: 2, kind: input, shape index: {}]   ;;  %s3976_s3 = inlined_call_operand.vmem [shape: f32[1,96], index: 3, kind: input, shape index: {}]   ;;  %s3977_s4 = inlined_call_operand.vmem [shape: f32[32,32], index: 4, kind: input, shape index: {}]   ;;  %s3978_s5 = inlined_call_operand.vmem [shape: f32[32,64], index: 5, kind: input, shape index: {}]   ;;  %s3979_s6 = inlined_call_operand.vmem [shape: f32[64,32], index: 6, kind: input, shape index: {}]   ;;  %s3980_s7 = inlined_call_operand.vmem [shape: f32[4,32], index: 7, kind: input, shape index: {}]   ;;  %s3981_s8 = inlined_call_operand.vmem [shape: f32[3,64], index: 8, kind: input, shape index: {}]   ;;  %s3982_s9 = inlined_call_operand.hbm [shape: f32[16,32], index: 9, kind: output, shape index: {}]  }
   0x1   :  { %v33_v0 = vld [vmem:[%s3973_s0] sm:$0xff]  ;;  %v34_v1 = vld [vmem:[%s3973_s0 + $0x8] sm:$0xff] }
   0x2   :  { %14 = vsyncpa [#allocation3], 0  ;;  %v49_v2 = vsel %vm48_vm0, %v33_v0, 0.0  ;;  %v52_v3 = vsel %vm48_vm0, %v34_v1, 0.0  ;;  %v102_v14 = vld [vmem:[%s3975_s2] sm:$0xff]  ;;  %v103_v15 = vld [vmem:[%s3975_s2 + $0x8] sm:$0xff]  ;;  %v209_v57 = vlaneseq }
   0x3   :  { %50 = vadd.xlane.f32.xlu0 %v49_v2  ;;  %v104_v16 = vld [vmem:[%s3975_s2 + $0x10] sm:$0xff]  ;;  %v3275_v17 = vpack.c.bf16 %v103_v15, %v102_v14  ;;  %v105_v18 = vld [vmem:[%s3975_s2 + $0x18] sm:$0xff]  ;;  %v3027_v36 = vld [vmem:[%s3980_s7] ss:$0 sm:$0xff]  ;;  %s3403_s26 = smov 112   ;;  %s3404_s27 = smov 120  }
   0x4   :  { %v3279_v19 = vpack.c.bf16 %v105_v18, %v104_v16  ;;  %v3028_v39 = vld [vmem:[%s3980_s7 + $0x1] ss:$0 sm:$0xff]  ;;  %v3029_v46 = vld [vmem:[%s3976_s3] ss:$0 sm:$0xff]  ;;  %s3405_s28 = smov 104   ;;  %s3406_s29 = smov 96  }
   0x5   :  { %3276 = vmatprep.subr.bf16.mxu1 %v3275_v17  ;;  %v3407_v54 = vmov 0.0   ;;  %vm3408_vm5 = vmmov 0   ;;  %v3409_v55 = vmov 1983009808   ;;  %v210_v59 = vshrl.u32 %v209_v57, 7  ;;  %s3411_s10 = smov 64  }
   0x6   :  { %3278 = vmatpush3.bf16.msra.mxu1 %v3275_v17  ;;  %3164 = vmatprep.subr.mxu0 %v3407_v54  ;;  %v207_v56 = vunpack.c.l.s4 %v3409_v55  ;;  %v3410_v60 = vmov 1934713408   ;;  %vm636_vm6 = vcmask 64512   ;;  %s3413_s13 = smov 16   ;;  %s3414_s14 = smov 24   ;;  %vm1434_vm9 = vcmask 130048  }
   0x7   :  { %53 = vadd.xlane.f32.xlu0 %v52_v3  ;;  %3280 = vmatprep.subr.bf16.mxu1 %v3279_v19  ;;  %v239_v61 = vunpack.c.l.s4 %v3410_v60  ;;  %vm1436_vm10 = vcmask 195584   ;;  %vm2925_vm15 = vcmask 523264  }
   0x8   :  { %3166 = vmatprep.mubr.msk.f32.mxu0 %vm3408_vm5, %v3407_v54  ;;  %v208_v58 = vunpack.c.0.s8 %v207_v56 }
   0x9   :  { %v240_v3 = vunpack.c.0.s8 %v239_v61 }
   0xa   :  { %3282 = vmatpush3.bf16.msra.mxu1 %v3279_v19 }
   0xb   :  { %3154 = vmatprep.subr.mxu1 %v3407_v54 }
  0x90   :  { %v51_v4 = vpop.xlane.xlu0 %50 }
  0x91   :  { %v56_v5 = vmul.f32 0.03125, %v51_v4 }
  0x93   :  { %v58_v6 = vsub.f32 %v33_v0, %v56_v5  ;;  %v3534_v0 = vsub.s32 %v208_v58, %v210_v59 }
  0x94   :  { %v54_v7 = vpop.xlane.xlu0 %53 }
  0x95   :  { %v57_v8 = vmul.f32 0.03125, %v54_v7  ;;  %v60_v9 = vmul.f32 %v58_v6, %v58_v6 }
  0x97   :  { %v59_v10 = vsub.f32 %v34_v1, %v57_v8  ;;  %v62_v11 = vsel %vm48_vm0, %v60_v9, 0.0  ;;  %v3544_v9 = vsub.s32 %v240_v3, %v210_v59 }
  0x98   :  { %63 = vadd.xlane.f32.xlu1 %v62_v11 }
  0x99   :  { %v61_v12 = vmul.f32 %v59_v10, %v59_v10 }
  0x9b   :  { %v65_v13 = vsel %vm48_vm0, %v61_v12, 0.0 }
  0x9c   :  { %66 = vadd.xlane.f32.xlu1 %v65_v13 }
 0x125   :  { %v64_v20 = vpop.xlane.xlu1 %63 }
 0x126   :  { %v68_v21 = vmul.f32 0.032258064, %v64_v20 }
 0x128   :  { %3329 = vrsqrt.f32 %v68_v21  ;;  %vm72_vm1 = vcmp.eq.f32.partialorder %v68_v21, inf  ;;  %v75_v26 = vand.u32 2147483648, %v68_v21  ;;  %vm74_vm2 = vcmp.eq.f32.partialorder %v68_v21, 0.0 }
 0x129   :  { %v67_v22 = vpop.xlane.xlu1 %66 }
 0x12a   :  { %v69_v23 = vmul.f32 0.032258064, %v67_v22 }
 0x12c   :  { %3331 = vrsqrt.f32 %v69_v23  ;;  %vm79_vm3 = vcmp.eq.f32.partialorder %v69_v23, inf  ;;  %v82_v32 = vand.u32 2147483648, %v69_v23  ;;  %vm81_vm4 = vcmp.eq.f32.partialorder %v69_v23, 0.0 }
 0x132   :  { %v3330_v24 = vpop.eup %3329 }
 0x133   :  { %v71_v25 = vmul.f32 %v3330_v24, %v68_v21 }
 0x135   :  { %v73_v27 = vsel %vm72_vm1, %v68_v21, %v71_v25 }
 0x136   :  { %v3332_v28 = vpop.eup %3331  ;;  %v76_v29 = vsel %vm74_vm2, %v75_v26, %v73_v27 }
 0x137   :  { %v78_v30 = vmul.f32 %v3332_v28, %v69_v23  ;;  %v84_v31 = vadd.f32 1e-06, %v76_v29 }
 0x139   :  { %v80_v33 = vsel %vm79_vm3, %v69_v23, %v78_v30  ;;  %3333 = vrcp.f32 %v84_v31 }
 0x13a   :  { %v83_v34 = vsel %vm81_vm4, %v82_v32, %v80_v33 }
 0x13b   :  { %v85_v35 = vadd.f32 1e-06, %v83_v34 }
 0x13d   :  { %3335 = vrcp.f32 %v85_v35 }
 0x143   :  { %v3334_v37 = vpop.eup %3333 }
 0x144   :  { %v92_v38 = vmul.f32 %v3334_v37, %v3027_v36 }
 0x146   :  { %v94_v40 = vmul.f32 %v92_v38, %v58_v6 }
 0x147   :  { %v3336_v41 = vpop.eup %3335 }
 0x148   :  { %v93_v42 = vmul.f32 %v3336_v41, %v3027_v36  ;;  %v100_v43 = vadd.f32 %v3028_v39, %v94_v40 }
 0x14a   :  { %v95_v44 = vmul.f32 %v93_v42, %v59_v10  ;;  %3151 = vmatprep.mubr.msk.f32.mxu1 %vm48_vm0, %v100_v43 }
 0x14c   :  { %v101_v45 = vadd.f32 %v3028_v39, %v95_v44 }
 0x14e   :  { %3152 = vmatmul.mubr.msk.f32.vlgmr.msra.gmra.mrb[0].mxu1 %vm48_vm0, %v101_v45 }
 0x14f   :  { %3156 = vmatprep.mubr.msk.f32.mxu1 %vm3408_vm5, %v3407_v54 }
 0x221   :  { %v3153_v47 = vpop.f32.mrb[0].mxu1 }
 0x222   :  { %v3500_v48 = vadd.f32 %v3153_v47, %v3029_v46  ;;  %v185_v49 = vpop.f32.mrb[1].mxu1 }
 0x223   :  { %v3502_v50 = vadd.f32 %v3029_v46, %v185_v49 }
 0x225   :  { %198 = vrot.lane.b32.xlu1 %v3502_v50, %s3403_s26  ;;  %195 = vrot.lane.b32.xlu0 %v3502_v50, %s3404_s27 }
 0x229   :  { %201 = vrot.lane.b32.xlu1 %v3502_v50, %s3405_s28 }
 0x22d   :  { %340 = vrot.lane.b32.xlu1 %v3502_v50, %s3406_s29 }
 0x297   :  { %v3512_v51 = vpop.permute.xlu1 %198  ;;  %v3514_v52 = vpop.permute.xlu0 %195 }
 0x298   :  { %344 = vrot.lane.b32.xlu1 %v3512_v51, %s3406_s29  ;;  %342 = vrot.lane.b32.xlu0 %v3514_v52, %s3406_s29  ;;  %v204_v1 = vcombine.low %v3502_v50, %v3512_v51  ;;  %v205_v2 = vcombine.high %v3502_v50, %v3512_v51 }
 0x29a   :  { %v212_v7 = vrot.slane %v204_v1, %v3534_v0  ;;  %v219_v8 = vrot.slane %v205_v2, %v3534_v0 }
 0x29b   :  { %v3520_v53 = vpop.permute.xlu1 %201 }
 0x29c   :  { %346 = vrot.lane.b32.xlu0 %v3520_v53, %s3406_s29  ;;  %v220_v62 = vcombine.low %v3514_v52, %v3520_v53  ;;  %v221_v63 = vcombine.high %v3514_v52, %v3520_v53 }
 0x29e   :  { %v228_v4 = vrot.slane %v220_v62, %v3534_v0  ;;  %v235_v5 = vrot.slane %v221_v63, %v3534_v0 }
 0x29f   :  { %v341_v6 = vpop.permute.xlu1 %340 }
 0x2a0   :  { %v236_v10 = vcombine.low %v212_v7, %v228_v4  ;;  %v237_v11 = vcombine.high %v212_v7, %v228_v4  ;;  %v252_v12 = vcombine.low %v219_v8, %v235_v5  ;;  %v253_v13 = vcombine.high %v219_v8, %v235_v5 }
 0x2a2   :  { %v244_v18 = vrot.slane %v236_v10, %v3544_v9  ;;  %v251_v19 = vrot.slane %v237_v11, %v3544_v9  ;;  %v260_v20 = vrot.slane %v252_v12, %v3544_v9  ;;  %v267_v21 = vrot.slane %v253_v13, %v3544_v9 }
 0x2a4   :  { %v272_v29 = vcombine.low %v244_v18, %v251_v19  ;;  %v3032_v30 = vcombine.high %v244_v18, %v251_v19  ;;  %v288_v31 = vcombine.low %v260_v20, %v267_v21  ;;  %v3033_v32 = vcombine.high %v260_v20, %v267_v21  ;;  %v42_v21 = vld [vmem:[%s3974_s1] sm:$0xff] }
 0x2a5   :  { %vm44_vm7 = vcmp.eq.f32.partialorder %v42_v21, 0.0 }
 0x2a6   :  { %v279_v41 = vrot.slane %v272_v29, %v3534_v0  ;;  %v287_v42 = vrot.slane %v3032_v30, %v3534_v0  ;;  %v295_v43 = vrot.slane %v288_v31, %v3534_v0  ;;  %v303_v44 = vrot.slane %v3033_v32, %v3534_v0 }
 0x2a8   :  { %v304_v59 = vcombine.low %v279_v41, %v287_v42  ;;  %v320_v60 = vcombine.low %v295_v43, %v303_v44  ;;  %v305_v61 = vcombine.high %v279_v41, %v287_v42  ;;  %v321_v62 = vcombine.high %v295_v43, %v303_v44 }
 0x2aa   :  { %v312_v8 = vrot.slane %v304_v59, %v3544_v9  ;;  %v328_v10 = vrot.slane %v320_v60, %v3544_v9  ;;  %v319_v11 = vrot.slane %v305_v61, %v3544_v9  ;;  %v335_v12 = vrot.slane %v321_v62, %v3544_v9 }
 0x2ac   :  { %v337_v18 = vcombine.high %v312_v8, %v328_v10  ;;  %v339_v20 = vcombine.high %v319_v11, %v335_v12 }
 0x30a   :  { %v345_v14 = vpop.permute.xlu1 %344  ;;  %v343_v15 = vpop.permute.xlu0 %342 }
 0x30b   :  { %v352_v16 = vcombine.low %v341_v6, %v345_v14  ;;  %v353_v17 = vcombine.high %v341_v6, %v345_v14 }
 0x30d   :  { %v360_v25 = vrot.slane %v352_v16, %v3534_v0  ;;  %v367_v26 = vrot.slane %v353_v17, %v3534_v0  ;;  %v338_v16 = vcombine.low %v319_v11, %v335_v12 }
 0x30e   :  { %v347_v22 = vpop.permute.xlu0 %346 }
 0x30f   :  { %v368_v23 = vcombine.low %v343_v15, %v347_v22  ;;  %v369_v24 = vcombine.high %v343_v15, %v347_v22  ;;  %v336_v15 = vcombine.low %v312_v8, %v328_v10 }
 0x311   :  { %v376_v27 = vrot.slane %v368_v23, %v3534_v0  ;;  %v383_v28 = vrot.slane %v369_v24, %v3534_v0  ;;  %v46_v24 = vsel %vm44_vm7, -1e+09, %v3407_v54 }
 0x313   :  { %v384_v33 = vcombine.low %v360_v25, %v376_v27  ;;  %v385_v34 = vcombine.high %v360_v25, %v376_v27  ;;  %v400_v35 = vcombine.low %v367_v26, %v383_v28  ;;  %v401_v36 = vcombine.high %v367_v26, %v383_v28 }
 0x315   :  { %v392_v37 = vrot.slane %v384_v33, %v3544_v9  ;;  %v399_v38 = vrot.slane %v385_v34, %v3544_v9  ;;  %v408_v39 = vrot.slane %v400_v35, %v3544_v9  ;;  %v415_v40 = vrot.slane %v401_v36, %v3544_v9 }
 0x317   :  { %v420_v45 = vcombine.low %v392_v37, %v399_v38  ;;  %v3034_v46 = vcombine.high %v392_v37, %v399_v38  ;;  %v436_v47 = vcombine.low %v408_v39, %v415_v40  ;;  %v3035_v49 = vcombine.high %v408_v39, %v415_v40 }
 0x319   :  { %v427_v55 = vrot.slane %v420_v45, %v3534_v0  ;;  %v435_v56 = vrot.slane %v3034_v46, %v3534_v0  ;;  %v443_v57 = vrot.slane %v436_v47, %v3534_v0  ;;  %v451_v58 = vrot.slane %v3035_v49, %v3534_v0 }
 0x31b   :  { %v452_v63 = vcombine.low %v427_v55, %v435_v56  ;;  %v468_v1 = vcombine.low %v443_v57, %v451_v58  ;;  %v453_v2 = vcombine.high %v427_v55, %v435_v56  ;;  %v469_v3 = vcombine.high %v443_v57, %v451_v58 }
 0x31d   :  { %v460_v4 = vrot.slane %v452_v63, %v3544_v9  ;;  %v476_v5 = vrot.slane %v468_v1, %v3544_v9  ;;  %v467_v6 = vrot.slane %v453_v2, %v3544_v9  ;;  %v483_v7 = vrot.slane %v469_v3, %v3544_v9 }
 0x31f   :  { %v484_v13 = vcombine.low %v460_v4, %v476_v5  ;;  %v486_v14 = vcombine.low %v467_v6, %v483_v7  ;;  %v485_v17 = vcombine.high %v460_v4, %v476_v5  ;;  %v487_v19 = vcombine.high %v467_v6, %v483_v7 }
 0x321   :  { %3155 = vmatpush3.xpose.msk.msra.mxu1 %vm636_vm6, %v484_v13  ;;  %3165 = vmatpush3.xpose.msk.msra.mxu0 %vm636_vm6, %v486_v14 }
 0x322   :  { %3159 = vmatprep.subr.mxu1 %v3407_v54  ;;  %3174 = vmatprep.subr.mxu0 %v3407_v54 }
 0x324   :  { %3157 = vmatmul.mubr.msk.f32.vlgmr.msra.gmra.mrb[2].mxu1 %vm636_vm6, %v336_v15  ;;  %3167 = vmatmul.mubr.msk.f32.vlgmr.msra.gmra.mrb[0].mxu0 %vm636_vm6, %v338_v16 }
 0x325   :  { %3160 = vmatpush3.xpose.msk.msra.mxu1 %vm636_vm6, %v485_v17  ;;  %3161 = vmatprep.mubr.msk.f32.mxu1 %vm3408_vm5, %v3407_v54 }
 0x326   :  { %3169 = vmatprep.subr.mxu1 %v3407_v54  ;;  %3176 = vmatprep.mubr.msk.f32.mxu0 %vm3408_vm5, %v3407_v54 }
 0x328   :  { %3162 = vmatmul.mubr.msk.f32.vlgmr.msra.gmra.mrb[4].mxu1 %vm636_vm6, %v337_v18 }
 0x329   :  { %3170 = vmatpush3.xpose.msk.msra.mxu1 %vm636_vm6, %v487_v19  ;;  %3171 = vmatprep.mubr.msk.f32.mxu1 %vm3408_vm5, %v3407_v54 }
 0x32a   :  { %3179 = vmatprep.subr.mxu1 %v3407_v54 }
 0x32c   :  { %3172 = vmatmul.mubr.msk.f32.vlgmr.msra.gmra.mrb[6].mxu1 %vm636_vm6, %v339_v20 }
 0x32d   :  { %3181 = vmatprep.mubr.msk.f32.mxu1 %vm3408_vm5, %v3407_v54 }
 0x3f7   :  { %v709_v22 = vpop.f32.mrb[2].mxu1  ;;  %v861_v23 = vpop.f32.mrb[0].mxu0 }
 0x3f8   :  { %v941_v25 = vmul.f32 0.35355338, %v709_v22  ;;  %v3158_v26 = vpop.f32.mrb[3].mxu1  ;;  %v3168_v27 = vpop.f32.mrb[1].mxu0  ;;  %v943_v30 = vmul.f32 0.35355338, %v861_v23 }
 0x3fa   :  { %v945_v28 = vadd.f32 %v941_v25, %v46_v24  ;;  %v947_v39 = vadd.f32 %v943_v30, %v46_v24 }
 0x3fb   :  { %v785_v29 = vpop.f32.mrb[4].mxu1 }
 0x3fc   :  { %v942_v31 = vmul.f32 0.35355338, %v785_v29  ;;  %v3163_v32 = vpop.f32.mrb[5].mxu1  ;;  %v949_v33 = vsel %vm636_vm6, %v945_v28, -inf  ;;  %v955_v40 = vsel %vm636_vm6, %v947_v39, -inf }
 0x3fd   :  { %950 = vmax.xlane.f32.xlu1 %v949_v33 }
 0x3fe   :  { %v946_v34 = vadd.f32 %v942_v31, %v46_v24 }
 0x3ff   :  { %v937_v35 = vpop.f32.mrb[6].mxu1 }
 0x400   :  { %v944_v36 = vmul.f32 0.35355338, %v937_v35  ;;  %v3173_v37 = vpop.f32.mrb[7].mxu1  ;;  %v952_v38 = vsel %vm636_vm6, %v946_v34, -inf }
 0x401   :  { %953 = vmax.xlane.f32.xlu0 %v952_v38 }
 0x402   :  { %v948_v41 = vadd.f32 %v944_v36, %v46_v24 }
 0x404   :  { %v958_v42 = vsel %vm636_vm6, %v948_v41, -inf }
 0x405   :  { %956 = vmax.xlane.f32.xlu0 %v955_v40 }
 0x409   :  { %959 = vmax.xlane.f32.xlu0 %v958_v42 }
 0x40e   :  { %1439 = vrot.lane.b32.xlu1 %v3500_v48, %s3404_s27 }
 0x412   :  { %1445 = vrot.lane.b32.xlu1 %v3500_v48, %s3405_s28 }
 0x416   :  { %490 = vrot.lane.b32.xlu1 %v3514_v52, %s3411_s10 }
 0x41a   :  { %492 = vrot.lane.b32.xlu1 %v3512_v51, %s3411_s10 }
 0x41e   :  { %494 = vrot.lane.b32.xlu1 %v3520_v53, %s3411_s10 }
 0x41f   :  { %1442 = vrot.lane.b32.xlu0 %v3500_v48, %s3403_s26 }
 0x423   :  { %488 = vrot.lane.b32.xlu0 %v3502_v50, %s3411_s10 }
 0x427   :  { %1584 = vrot.lane.b32.xlu0 %v3500_v48, %s3406_s29 }
 0x48a   :  { %v951_v43 = vpop.xlane.xlu1 %950 }
 0x48b   :  { %v961_v58 = vsub.f32 %v945_v28, %v951_v43 }
 0x48d   :  { %v965_v2 = vmul.f32 1.442695, %v961_v58 }
 0x48e   :  { %v3618_v44 = vpop.permute.xlu1 %1439  ;;  %v954_v45 = vpop.xlane.xlu0 %953 }
 0x48f   :  { %1586 = vrot.lane.b32.xlu1 %v3618_v44, %s3406_s29  ;;  %v962_v46 = vsub.f32 %v946_v34, %v954_v45 }
 0x491   :  { %v967_v56 = vmul.f32 1.442695, %v962_v46 }
 0x492   :  { %v3622_v51 = vpop.permute.xlu1 %1445  ;;  %v957_v52 = vpop.xlane.xlu0 %956 }
 0x493   :  { %v963_v53 = vsub.f32 %v947_v39, %v957_v52 }
 0x495   :  { %v969_v47 = vmul.f32 1.442695, %v963_v53 }
 0x496   :  { %v491_v49 = vpop.permute.xlu1 %490  ;;  %v960_v55 = vpop.xlane.xlu0 %959 }
 0x497   :  { %3337 = vpow2.f32 %v969_v47  ;;  %v964_v3 = vsub.f32 %v948_v41, %v960_v55 }
 0x498   :  { %3339 = vpow2.f32 %v967_v56  ;;  %v1464_v56 = vcombine.low %v3618_v44, %v3622_v51 }
 0x499   :  { %3341 = vpow2.f32 %v965_v2  ;;  %v971_v14 = vmul.f32 1.442695, %v964_v3 }
 0x49a   :  { %v493_v50 = vpop.permute.xlu1 %492  ;;  %v3624_v57 = vpop.permute.xlu0 %1442 }
 0x49b   :  { %3343 = vpow2.f32 %v971_v14  ;;  %v1449_v55 = vcombine.high %v3500_v48, %v3624_v57 }
 0x49e   :  { %v495_v59 = vpop.permute.xlu1 %494  ;;  %v489_v60 = vpop.permute.xlu0 %488 }
 0x49f   :  { %v516_v61 = vcombine.low %v491_v49, %v495_v59  ;;  %v517_v62 = vcombine.high %v491_v49, %v495_v59  ;;  %v500_v63 = vcombine.low %v489_v60, %v493_v50  ;;  %v501_v1 = vcombine.high %v489_v60, %v493_v50 }
 0x4a0   :  { %v1448_v49 = vcombine.low %v3500_v48, %v3624_v57  ;;  %v1465_v50 = vcombine.high %v3618_v44, %v3622_v51  ;;  %v1463_v60 = vrot.slane %v1449_v55, %v3534_v0 }
 0x4a1   :  { %v524_v4 = vrot.slane %v516_v61, %v3534_v0  ;;  %v531_v5 = vrot.slane %v517_v62, %v3534_v0  ;;  %v508_v6 = vrot.slane %v500_v63, %v3534_v0  ;;  %v515_v7 = vrot.slane %v501_v1, %v3534_v0  ;;  %v3630_v8 = vpop.eup %3337 }
 0x4a2   :  { %v979_v19 = vsel %vm636_vm6, %v3630_v8, 0.0  ;;  %v3340_v20 = vpop.eup %3339  ;;  %v1585_v53 = vpop.permute.xlu0 %1584  ;;  %v1456_v59 = vrot.slane %v1448_v49, %v3534_v0  ;;  %v1472_v61 = vrot.slane %v1464_v56, %v3534_v0  ;;  %v1479_v62 = vrot.slane %v1465_v50, %v3534_v0 }
 0x4a3   :  { %v532_v10 = vcombine.low %v508_v6, %v524_v4  ;;  %v533_v11 = vcombine.high %v508_v6, %v524_v4  ;;  %v548_v12 = vcombine.low %v515_v7, %v531_v5  ;;  %v549_v13 = vcombine.high %v515_v7, %v531_v5  ;;  %980 = vadd.xlane.f32.xlu0 %v979_v19  ;;  %v3651_v38 = vpop.eup %3341 }
 0x4a4   :  { %v976_v29 = vsel %vm636_vm6, %v3340_v20, 0.0  ;;  %v973_v43 = vsel %vm636_vm6, %v3651_v38, 0.0  ;;  %v1480_v1 = vcombine.low %v1456_v59, %v1472_v61  ;;  %v1481_v2 = vcombine.high %v1456_v59, %v1472_v61 }
 0x4a5   :  { %v540_v15 = vrot.slane %v532_v10, %v3544_v9  ;;  %v547_v16 = vrot.slane %v533_v11, %v3544_v9  ;;  %v556_v17 = vrot.slane %v548_v12, %v3544_v9  ;;  %v563_v18 = vrot.slane %v549_v13, %v3544_v9  ;;  %v3659_v45 = vpop.eup %3343 }
 0x4a6   :  { %v982_v52 = vsel %vm636_vm6, %v3659_v45, 0.0  ;;  %v1496_v3 = vcombine.low %v1463_v60, %v1479_v62  ;;  %v1497_v4 = vcombine.high %v1463_v60, %v1479_v62  ;;  %v1488_v11 = vrot.slane %v1480_v1, %v3544_v9 }
 0x4a7   :  { %v568_v21 = vcombine.low %v540_v15, %v547_v16  ;;  %v3036_v22 = vcombine.high %v540_v15, %v547_v16  ;;  %v584_v23 = vcombine.low %v556_v17, %v563_v18  ;;  %v3037_v24 = vcombine.high %v556_v17, %v563_v18  ;;  %977 = vadd.xlane.f32.xlu0 %v976_v29 }
 0x4a8   :  { %v1495_v12 = vrot.slane %v1481_v2, %v3544_v9  ;;  %v1504_v13 = vrot.slane %v1496_v3, %v3544_v9  ;;  %v1511_v14 = vrot.slane %v1497_v4, %v3544_v9 }
 0x4a9   :  { %v575_v25 = vrot.slane %v568_v21, %v3534_v0  ;;  %v583_v26 = vrot.slane %v3036_v22, %v3534_v0  ;;  %v591_v27 = vrot.slane %v584_v23, %v3534_v0  ;;  %v599_v28 = vrot.slane %v3037_v24, %v3534_v0 }
 0x4aa   :  { %v3052_v21 = vcombine.high %v1488_v11, %v1495_v12  ;;  %v1532_v22 = vcombine.low %v1504_v13, %v1511_v14  ;;  %v3053_v23 = vcombine.high %v1504_v13, %v1511_v14 }
 0x4ab   :  { %v600_v30 = vcombine.low %v575_v25, %v583_v26  ;;  %v616_v31 = vcombine.low %v591_v27, %v599_v28  ;;  %v601_v32 = vcombine.high %v575_v25, %v583_v26  ;;  %v617_v33 = vcombine.high %v591_v27, %v599_v28 }
 0x4ad   :  { %v608_v34 = vrot.slane %v600_v30, %v3544_v9  ;;  %v624_v35 = vrot.slane %v616_v31, %v3544_v9  ;;  %v3646_v36 = vrot.slane %v601_v32, %v3544_v9  ;;  %v3649_v37 = vrot.slane %v617_v33, %v3544_v9 }
 0x4af   :  { %v632_v39 = vcombine.low %v608_v34, %v624_v35  ;;  %v633_v40 = vcombine.high %v608_v34, %v624_v35  ;;  %v635_v41 = vcombine.high %v3646_v36, %v3649_v37  ;;  %v634_v42 = vcombine.low %v3646_v36, %v3649_v37 }
 0x4b1   :  { %3175 = vmatpush3.msra.mxu0 %v632_v39  ;;  %3180 = vmatpush3.msra.mxu1 %v633_v40  ;;  %v1531_v39 = vrot.slane %v3052_v21, %v3534_v0  ;;  %v1539_v40 = vrot.slane %v1532_v22, %v3534_v0 }
 0x4b2   :  { %3189 = vmatprep.subr.mxu1 %v3407_v54  ;;  %3184 = vmatprep.subr.mxu0 %v3407_v54 }
 0x4b3   :  { %974 = vadd.xlane.f32.xlu1 %v973_v43 }
 0x4b7   :  { %983 = vadd.xlane.f32.xlu1 %v982_v52 }
 0x4bd   :  { %1588 = vrot.lane.b32.xlu0 %v3624_v57, %s3406_s29 }
 0x4c8   :  { %1590 = vrot.lane.b32.xlu1 %v3622_v51, %s3406_s29 }
 0x501   :  { %v1587_v58 = vpop.permute.xlu1 %1586 }
 0x530   :  { %v981_v46 = vpop.xlane.xlu0 %980 }
 0x534   :  { %v978_v47 = vpop.xlane.xlu0 %977 }
 0x535   :  { %3345 = vrcp.f32 %v978_v47 }
 0x538   :  { %v1589_v6 = vpop.permute.xlu0 %1588 }
 0x539   :  { %v1596_v15 = vcombine.low %v1585_v53, %v1589_v6  ;;  %v1597_v16 = vcombine.high %v1585_v53, %v1589_v6 }
 0x53b   :  { %v1604_v25 = vrot.slane %v1596_v15, %v3534_v0  ;;  %v1611_v26 = vrot.slane %v1597_v16, %v3534_v0 }
 0x53f   :  { %v3346_v5 = vpop.eup %3345 }
 0x540   :  { %v975_v63 = vpop.xlane.xlu1 %974  ;;  %v990_v10 = vmul.f32 %v3346_v5, %v3340_v20  ;;  %v1516_v20 = vcombine.low %v1488_v11, %v1495_v12 }
 0x541   :  { %3347 = vrcp.f32 %v975_v63 }
 0x542   :  { %3349 = vrcp.f32 %v981_v46  ;;  %3182 = vmatmul.mubr.msk.f32.vlgmr.msra.gmra.mrb[8].mxu1 %vm636_vm6, %v990_v10  ;;  %v1523_v35 = vrot.slane %v1516_v20, %v3534_v0 }
 0x543   :  { %3190 = vmatpush3.msra.mxu1 %v635_v41  ;;  %3191 = vmatprep.mubr.msk.f32.mxu1 %vm3408_vm5, %v3407_v54  ;;  %v1547_v41 = vrot.slane %v3053_v23, %v3534_v0 }
 0x544   :  { %v984_v7 = vpop.xlane.xlu1 %983  ;;  %3199 = vmatprep.subr.mxu1 %v3407_v54  ;;  %v1548_v59 = vcombine.low %v1523_v35, %v1531_v39  ;;  %v1549_v5 = vcombine.high %v1523_v35, %v1531_v39 }
 0x545   :  { %3351 = vrcp.f32 %v984_v7  ;;  %v1564_v36 = vcombine.low %v1539_v40, %v1547_v41  ;;  %v1565_v6 = vcombine.high %v1539_v40, %v1547_v41 }
 0x546   :  { %v1556_v3 = vrot.slane %v1548_v59, %v3544_v9  ;;  %v1563_v15 = vrot.slane %v1549_v5, %v3544_v9 }
 0x547   :  { %v1572_v4 = vrot.slane %v1564_v36, %v3544_v9  ;;  %v1579_v16 = vrot.slane %v1565_v6, %v3544_v9 }
 0x548   :  { %v1591_v17 = vpop.permute.xlu1 %1590 }
 0x549   :  { %v1612_v18 = vcombine.low %v1587_v58, %v1591_v17  ;;  %v1613_v19 = vcombine.high %v1587_v58, %v1591_v17  ;;  %v1580_v13 = vcombine.low %v1556_v3, %v1572_v4  ;;  %v1581_v14 = vcombine.high %v1556_v3, %v1572_v4 }
 0x54a   :  { %v1583_v20 = vcombine.high %v1563_v15, %v1579_v16 }
 0x54b   :  { %v3348_v24 = vpop.eup %3347  ;;  %v1620_v27 = vrot.slane %v1612_v18, %v3534_v0  ;;  %v1627_v28 = vrot.slane %v1613_v19, %v3534_v0  ;;  %v1582_v19 = vcombine.low %v1563_v15, %v1579_v16 }
 0x54c   :  { %v989_v29 = vmul.f32 %v3348_v24, %v3651_v38  ;;  %v3350_v30 = vpop.eup %3349 }
 0x54d   :  { %v1628_v31 = vcombine.low %v1604_v25, %v1620_v27  ;;  %v1629_v32 = vcombine.high %v1604_v25, %v1620_v27  ;;  %v1644_v33 = vcombine.low %v1611_v26, %v1627_v28  ;;  %v1645_v34 = vcombine.high %v1611_v26, %v1627_v28 }
 0x54e   :  { %3177 = vmatmul.mubr.msk.f32.vlgmr.msra.gmra.mrb[2].mxu0 %vm636_vm6, %v989_v29  ;;  %v991_v47 = vmul.f32 %v3350_v30, %v3630_v8 }
 0x54f   :  { %v3352_v43 = vpop.eup %3351  ;;  %v1636_v52 = vrot.slane %v1628_v31, %v3544_v9  ;;  %v1643_v38 = vrot.slane %v1629_v32, %v3544_v9  ;;  %v1652_v53 = vrot.slane %v1644_v33, %v3544_v9  ;;  %v1659_v46 = vrot.slane %v1645_v34, %v3544_v9  ;;  %3185 = vmatpush3.msra.mxu0 %v634_v42 }
 0x550   :  { %v992_v49 = vmul.f32 %v3352_v43, %v3659_v45  ;;  %3186 = vmatprep.mubr.msk.f32.mxu0 %vm3408_vm5, %v3407_v54  ;;  %3194 = vmatprep.subr.mxu0 %v3407_v54 }
 0x551   :  { %v1664_v55 = vcombine.low %v1636_v52, %v1643_v38  ;;  %v3054_v56 = vcombine.high %v1636_v52, %v1643_v38  ;;  %v1680_v50 = vcombine.low %v1652_v53, %v1659_v46  ;;  %v3055_v58 = vcombine.high %v1652_v53, %v1659_v46  ;;  %v43_v38 = vld [vmem:[%s3974_s1 + $0x8] sm:$0xff]  ;;  %s3412_s1 = smov 8  }
 0x552   :  { %3187 = vmatmul.mubr.msk.f32.vlgmr.msra.gmra.mrb[4].mxu0 %vm636_vm6, %v991_v47  ;;  %3192 = vmatmul.mubr.msk.f32.vlgmr.msra.gmra.mrb[10].mxu1 %vm636_vm6, %v992_v49  ;;  %vm45_vm8 = vcmp.eq.f32.partialorder %v43_v38, 0.0 }
 0x553   :  { %v1671_v37 = vrot.slane %v1664_v55, %v3534_v0  ;;  %v1679_v8 = vrot.slane %v3054_v56, %v3534_v0  ;;  %v1687_v42 = vrot.slane %v1680_v50, %v3534_v0  ;;  %v1695_v45 = vrot.slane %v3055_v58, %v3534_v0  ;;  %3196 = vmatprep.mubr.msk.f32.mxu0 %vm3408_vm5, %v3407_v54 }
 0x554   :  { %3201 = vmatprep.mubr.msk.f32.mxu1 %vm3408_vm5, %v3407_v54 }
 0x555   :  { %v1696_v60 = vcombine.low %v1671_v37, %v1679_v8  ;;  %v1697_v61 = vcombine.high %v1671_v37, %v1679_v8  ;;  %v1712_v62 = vcombine.low %v1687_v42, %v1695_v45  ;;  %v1713_v63 = vcombine.high %v1687_v42, %v1695_v45 }
 0x557   :  { %v1704_v1 = vrot.slane %v1696_v60, %v3544_v9  ;;  %v1720_v2 = vrot.slane %v1712_v62, %v3544_v9  ;;  %v1711_v11 = vrot.slane %v1697_v61, %v3544_v9  ;;  %v1727_v12 = vrot.slane %v1713_v63, %v3544_v9 }
 0x558   :  { %v47_v60 = vsel %vm45_vm8, -1e+09, %v3407_v54 }
 0x559   :  { %v1728_v7 = vcombine.low %v1704_v1, %v1720_v2  ;;  %v1729_v10 = vcombine.high %v1704_v1, %v1720_v2  ;;  %v1730_v17 = vcombine.low %v1711_v11, %v1727_v12  ;;  %v1731_v18 = vcombine.high %v1711_v11, %v1727_v12 }
 0x55b   :  { %3195 = vmatpush3.xpose.msk.msra.mxu0 %vm636_vm6, %v1728_v7  ;;  %3200 = vmatpush3.xpose.msk.msra.mxu1 %vm636_vm6, %v1729_v10 }
 0x55c   :  { %3204 = vmatprep.subr.mxu0 %v3407_v54  ;;  %3209 = vmatprep.subr.mxu1 %v3407_v54 }
 0x55e   :  { %3197 = vmatmul.mubr.msk.f32.vlgmr.msra.gmra.mrb[6].mxu0 %vm636_vm6, %v1580_v13  ;;  %3202 = vmatmul.mubr.msk.f32.vlgmr.msra.gmra.mrb[12].mxu1 %vm636_vm6, %v1581_v14 }
 0x55f   :  { %3205 = vmatpush3.xpose.msk.msra.mxu0 %vm636_vm6, %v1730_v17  ;;  %3210 = vmatpush3.xpose.msk.msra.mxu1 %vm636_vm6, %v1731_v18 }
 0x560   :  { %3206 = vmatprep.mubr.msk.f32.mxu0 %vm3408_vm5, %v3407_v54  ;;  %3211 = vmatprep.mubr.msk.f32.mxu1 %vm3408_vm5, %v3407_v54 }
 0x561   :  { %3214 = vmatprep.subr.mxu0 %v3407_v54  ;;  %3219 = vmatprep.subr.mxu1 %v3407_v54 }
 0x562   :  { %3207 = vmatmul.mubr.msk.f32.vlgmr.msra.gmra.mrb[8].mxu0 %vm636_vm6, %v1582_v19  ;;  %3212 = vmatmul.mubr.msk.f32.vlgmr.msra.gmra.mrb[14].mxu1 %vm636_vm6, %v1583_v20 }
 0x563   :  { %3216 = vmatprep.mubr.msk.f32.mxu0 %vm3408_vm5, %v3407_v54  ;;  %3221 = vmatprep.mubr.msk.f32.mxu1 %vm3408_vm5, %v3407_v54 }
 0x615   :  { %v1135_v21 = vpop.f32.mrb[8].mxu1 }
 0x616   :  { %v3183_v22 = vpop.f32.mrb[9].mxu1 }
 0x621   :  { %v1062_v23 = vpop.f32.mrb[2].mxu0 }
 0x622   :  { %v3178_v24 = vpop.f32.mrb[3].mxu0 }
 0x625   :  { %v1208_v25 = vpop.f32.mrb[4].mxu0  ;;  %v1281_v26 = vpop.f32.mrb[10].mxu1 }
 0x626   :  { %v1285_v27 = vcombine.low %v1062_v23, %v1208_v25  ;;  %v1286_v28 = vcombine.high %v1062_v23, %v1208_v25  ;;  %v1301_v29 = vcombine.low %v1135_v21, %v1281_v26  ;;  %v1302_v30 = vcombine.high %v1135_v21, %v1281_v26  ;;  %v3188_v31 = vpop.f32.mrb[5].mxu0  ;;  %v3193_v32 = vpop.f32.mrb[11].mxu1 }
 0x628   :  { %v1293_v33 = vrot.slane %v1285_v27, %v3534_v0  ;;  %v1300_v34 = vrot.slane %v1286_v28, %v3534_v0  ;;  %v1309_v35 = vrot.slane %v1301_v29, %v3534_v0  ;;  %v1316_v39 = vrot.slane %v1302_v30, %v3534_v0 }
 0x62a   :  { %v1317_v40 = vcombine.low %v1293_v33, %v1309_v35  ;;  %v1318_v41 = vcombine.high %v1293_v33, %v1309_v35  ;;  %v1333_v43 = vcombine.low %v1300_v34, %v1316_v39  ;;  %v1334_v52 = vcombine.high %v1300_v34, %v1316_v39 }
 0x62c   :  { %v1325_v53 = vrot.slane %v1317_v40, %v3544_v9  ;;  %v1332_v46 = vrot.slane %v1318_v41, %v3544_v9  ;;  %v1341_v47 = vrot.slane %v1333_v43, %v3544_v9  ;;  %v1348_v49 = vrot.slane %v1334_v52, %v3544_v9 }
 0x62e   :  { %v1353_v55 = vcombine.low %v1325_v53, %v1332_v46  ;;  %v3050_v56 = vcombine.high %v1325_v53, %v1332_v46  ;;  %v1369_v50 = vcombine.low %v1341_v47, %v1348_v49  ;;  %v3051_v58 = vcombine.high %v1341_v47, %v1348_v49 }
 0x630   :  { %v1360_v59 = vrot.slane %v1353_v55, %v3534_v0  ;;  %v1368_v36 = vrot.slane %v3050_v56, %v3534_v0  ;;  %v1376_v37 = vrot.slane %v1369_v50, %v3534_v0  ;;  %v1384_v8 = vrot.slane %v3051_v58, %v3534_v0 }
 0x631   :  { %v1952_v42 = vpop.f32.mrb[6].mxu0  ;;  %v2028_v45 = vpop.f32.mrb[12].mxu1 }
 0x632   :  { %v2184_v61 = vmul.f32 0.35355338, %v1952_v42  ;;  %v2185_v62 = vmul.f32 0.35355338, %v2028_v45  ;;  %v3198_v63 = vpop.f32.mrb[7].mxu0  ;;  %v3203_v1 = vpop.f32.mrb[13].mxu1  ;;  %v1385_v2 = vcombine.low %v1360_v59, %v1368_v36  ;;  %v1401_v3 = vcombine.low %v1376_v37, %v1384_v8 }
 0x633   :  { %v1386_v4 = vcombine.high %v1360_v59, %v1368_v36  ;;  %v1402_v5 = vcombine.high %v1376_v37, %v1384_v8 }
 0x634   :  { %v2188_v6 = vadd.f32 %v2184_v61, %v47_v60  ;;  %v2189_v7 = vadd.f32 %v2185_v62, %v47_v60  ;;  %v3766_v10 = vrot.slane %v1385_v2, %v3544_v9  ;;  %v3769_v11 = vrot.slane %v1401_v3, %v3544_v9 }
 0x635   :  { %v2104_v12 = vpop.f32.mrb[8].mxu0  ;;  %v2180_v13 = vpop.f32.mrb[14].mxu1  ;;  %v1400_v14 = vrot.slane %v1386_v4, %v3544_v9  ;;  %v1416_v15 = vrot.slane %v1402_v5, %v3544_v9 }
 0x636   :  { %v2186_v16 = vmul.f32 0.35355338, %v2104_v12  ;;  %v2187_v17 = vmul.f32 0.35355338, %v2180_v13  ;;  %v3208_v18 = vpop.f32.mrb[9].mxu0  ;;  %v3213_v19 = vpop.f32.mrb[15].mxu1  ;;  %v1418_v20 = vcombine.high %v3766_v10, %v3769_v11  ;;  %v1417_v21 = vcombine.low %v3766_v10, %v3769_v11 }
 0x637   :  { %v2192_v22 = vsel %vm636_vm6, %v2188_v6, -inf  ;;  %v2195_v23 = vsel %vm636_vm6, %v2189_v7, -inf  ;;  %v1419_v24 = vcombine.low %v1400_v14, %v1416_v15  ;;  %v1420_v25 = vcombine.high %v1400_v14, %v1416_v15  ;;  %v2679_v10 = vld [vmem:[%s3977_s4] sm:$0xff]  ;;  %v2680_v11 = vld [vmem:[%s3977_s4 + $0x8] sm:$0xff] }
 0x638   :  { %2193 = vmax.xlane.f32.xlu0 %v2192_v22  ;;  %2196 = vmax.xlane.f32.xlu1 %v2195_v23  ;;  %v2190_v26 = vadd.f32 %v2186_v16, %v47_v60  ;;  %v2191_v28 = vadd.f32 %v2187_v17, %v47_v60 }
 0x63a   :  { %v2198_v27 = vsel %vm636_vm6, %v2190_v26, -inf  ;;  %v2201_v29 = vsel %vm636_vm6, %v2191_v28, -inf }
 0x63c   :  { %2199 = vmax.xlane.f32.xlu0 %v2198_v27 }
 0x640   :  { %2202 = vmax.xlane.f32.xlu0 %v2201_v29 }
 0x6c5   :  { %v2194_v30 = vpop.xlane.xlu0 %2193  ;;  %v2197_v31 = vpop.xlane.xlu1 %2196 }
 0x6c6   :  { %v2204_v32 = vsub.f32 %v2188_v6, %v2194_v30  ;;  %v2205_v33 = vsub.f32 %v2189_v7, %v2197_v31 }
 0x6c8   :  { %v2208_v34 = vmul.f32 1.442695, %v2204_v32  ;;  %v2210_v35 = vmul.f32 1.442695, %v2205_v33 }
 0x6c9   :  { %v2200_v39 = vpop.xlane.xlu0 %2199 }
 0x6ca   :  { %3353 = vpow2.f32 %v2208_v34  ;;  %v2206_v40 = vsub.f32 %v2190_v26, %v2200_v39 }
 0x6cb   :  { %3355 = vpow2.f32 %v2210_v35 }
 0x6cc   :  { %v2212_v41 = vmul.f32 1.442695, %v2206_v40 }
 0x6cd   :  { %v2203_v49 = vpop.xlane.xlu0 %2202 }
 0x6ce   :  { %3357 = vpow2.f32 %v2212_v41  ;;  %v2207_v55 = vsub.f32 %v2191_v28, %v2203_v49 }
 0x6d0   :  { %v2214_v56 = vmul.f32 1.442695, %v2207_v55 }
 0x6d2   :  { %3359 = vpow2.f32 %v2214_v56 }
 0x6d4   :  { %v3781_v43 = vpop.eup %3353 }
 0x6d5   :  { %v3783_v52 = vpop.eup %3355  ;;  %v2216_v38 = vsel %vm636_vm6, %v3781_v43, 0.0 }
 0x6d6   :  { %v2219_v53 = vsel %vm636_vm6, %v3783_v52, 0.0  ;;  %2217 = vadd.xlane.f32.xlu0 %v2216_v38 }
 0x6d7   :  { %2220 = vadd.xlane.f32.xlu1 %v2219_v53 }
 0x6d8   :  { %v3789_v46 = vpop.eup %3357 }
 0x6d9   :  { %v2222_v47 = vsel %vm636_vm6, %v3789_v46, 0.0 }
 0x6da   :  { %2223 = vadd.xlane.f32.xlu0 %v2222_v47 }
 0x6dc   :  { %v3800_v50 = vpop.eup %3359 }
 0x6dd   :  { %v2225_v58 = vsel %vm636_vm6, %v3800_v50, 0.0 }
 0x6e8   :  { %1734 = vrot.lane.b32.xlu1 %v3618_v44, %s3411_s10 }
 0x6ec   :  { %1736 = vrot.lane.b32.xlu1 %v3624_v57, %s3411_s10 }
 0x6f0   :  { %1732 = vrot.lane.b32.xlu0 %v3500_v48, %s3411_s10 }
 0x6f4   :  { %1422 = vrot.lane.b32.xlu0 %v1418_v20, %s3412_s1 }
 0x710   :  { %2226 = vadd.xlane.f32.xlu1 %v2225_v58 }
 0x721   :  { %1738 = vrot.lane.b32.xlu1 %v3622_v51, %s3411_s10 }
 0x725   :  { %1426 = vrot.lane.b32.xlu1 %v1419_v24, %s3413_s13 }
 0x729   :  { %1430 = vrot.lane.b32.xlu1 %v1420_v25, %s3414_s14 }
 0x763   :  { %v2218_v44 = vpop.xlane.xlu0 %2217 }
 0x764   :  { %v2221_v48 = vpop.xlane.xlu1 %2220  ;;  %3361 = vrcp.f32 %v2218_v44 }
 0x765   :  { %3363 = vrcp.f32 %v2221_v48 }
 0x767   :  { %v2224_v59 = vpop.xlane.xlu0 %2223 }
 0x768   :  { %v1735_v57 = vpop.permute.xlu1 %1734  ;;  %3365 = vrcp.f32 %v2224_v59 }
 0x76b   :  { %v1733_v37 = vpop.permute.xlu0 %1732 }
 0x76c   :  { %v1737_v36 = vpop.permute.xlu1 %1736 }
 0x76d   :  { %v1744_v42 = vcombine.low %v1733_v37, %v1737_v36  ;;  %v1745_v45 = vcombine.high %v1733_v37, %v1737_v36 }
 0x76e   :  { %v3362_v24 = vpop.eup %3361 }
 0x76f   :  { %v1752_v51 = vrot.slane %v1744_v42, %v3534_v0  ;;  %v1759_v63 = vrot.slane %v1745_v45, %v3534_v0  ;;  %v3364_v29 = vpop.eup %3363  ;;  %v2232_v53 = vmul.f32 %v3362_v24, %v3781_v43  ;;  %v1423_v47 = vpop.permute.xlu0 %1422 }
 0x770   :  { %v2233_v38 = vmul.f32 %v3364_v29, %v3783_v52  ;;  %v1433_v43 = vsel %vm636_vm6, %v1417_v21, %v1423_v47  ;;  %v3283_v21 = vpack.c.bf16 %v2680_v11, %v2679_v10 }
 0x772   :  { %v3366_v33 = vpop.eup %3365 }
 0x773   :  { %v2234_v52 = vmul.f32 %v3366_v33, %v3789_v46 }
 0x79d   :  { %v2227_v8 = vpop.xlane.xlu1 %2226 }
 0x79e   :  { %3367 = vrcp.f32 %v2227_v8 }
 0x7a1   :  { %v1739_v60 = vpop.permute.xlu1 %1738 }
 0x7a2   :  { %v1760_v61 = vcombine.low %v1735_v57, %v1739_v60  ;;  %v1761_v62 = vcombine.high %v1735_v57, %v1739_v60 }
 0x7a4   :  { %v1768_v1 = vrot.slane %v1760_v61, %v3534_v0  ;;  %v1775_v2 = vrot.slane %v1761_v62, %v3534_v0 }
 0x7a5   :  { %v1427_v30 = vpop.permute.xlu1 %1426 }
 0x7a6   :  { %v1776_v3 = vcombine.low %v1752_v51, %v1768_v1  ;;  %v1777_v4 = vcombine.high %v1752_v51, %v1768_v1  ;;  %v1792_v5 = vcombine.low %v1759_v63, %v1775_v2  ;;  %v1793_v6 = vcombine.high %v1759_v63, %v1775_v2 }
 0x7a7   :  { %v1435_v48 = vsel %vm1434_vm9, %v1433_v43, %v1427_v30 }
 0x7a8   :  { %v1784_v7 = vrot.slane %v1776_v3, %v3544_v9  ;;  %v1791_v12 = vrot.slane %v1777_v4, %v3544_v9  ;;  %v1800_v13 = vrot.slane %v1792_v5, %v3544_v9  ;;  %v1807_v14 = vrot.slane %v1793_v6, %v3544_v9  ;;  %v3368_v41 = vpop.eup %3367  ;;  %v2681_v6 = vld [vmem:[%s3977_s4 + $0x10] sm:$0xff] }
 0x7a9   :  { %v1431_v56 = vpop.permute.xlu1 %1430  ;;  %v2235_v58 = vmul.f32 %v3368_v41, %v3800_v50 }
 0x7aa   :  { %v1812_v15 = vcombine.low %v1784_v7, %v1791_v12  ;;  %v3056_v16 = vcombine.high %v1784_v7, %v1791_v12  ;;  %v1828_v17 = vcombine.low %v1800_v13, %v1807_v14  ;;  %v3057_v18 = vcombine.high %v1800_v13, %v1807_v14  ;;  %v2682_v7 = vld [vmem:[%s3977_s4 + $0x18] sm:$0xff] }
 0x7ab   :  { %v1437_v44 = vsel %vm1436_vm10, %v1435_v48, %v1431_v56 }
 0x7ac   :  { %v1819_v19 = vrot.slane %v1812_v15, %v3534_v0  ;;  %v1827_v20 = vrot.slane %v3056_v16, %v3534_v0  ;;  %v1835_v22 = vrot.slane %v1828_v17, %v3534_v0  ;;  %v1843_v23 = vrot.slane %v3057_v18, %v3534_v0 }
 0x7ad   :  { %v3287_v16 = vpack.c.bf16 %v2682_v7, %v2681_v6  ;;  %v2916_v6 = vld [vmem:[%s3979_s6 + $0x18] sm:$0xff] }
 0x7ae   :  { %v1844_v25 = vcombine.low %v1819_v19, %v1827_v20  ;;  %v1860_v26 = vcombine.low %v1835_v22, %v1843_v23  ;;  %v1845_v27 = vcombine.high %v1819_v19, %v1827_v20  ;;  %v1861_v28 = vcombine.high %v1835_v22, %v1843_v23 }
 0x7b0   :  { %v1852_v31 = vrot.slane %v1844_v25, %v3544_v9  ;;  %v1868_v32 = vrot.slane %v1860_v26, %v3544_v9  ;;  %v1859_v34 = vrot.slane %v1845_v27, %v3544_v9  ;;  %v1875_v35 = vrot.slane %v1861_v28, %v3544_v9 }
 0x7b2   :  { %v1876_v39 = vcombine.low %v1852_v31, %v1868_v32  ;;  %v1877_v40 = vcombine.high %v1852_v31, %v1868_v32  ;;  %v1878_v49 = vcombine.low %v1859_v34, %v1875_v35  ;;  %v1879_v55 = vcombine.high %v1859_v34, %v1875_v35 }
 0x7b4   :  { %3215 = vmatpush3.msra.mxu0 %v1876_v39  ;;  %3220 = vmatpush3.msra.mxu1 %v1877_v40 }
 0x7b5   :  { %3217 = vmatmul.mubr.msk.f32.vlgmr.msra.gmra.mrb[10].mxu0 %vm636_vm6, %v2232_v53  ;;  %3222 = vmatmul.mubr.msk.f32.vlgmr.msra.gmra.mrb[16].mxu1 %vm636_vm6, %v2233_v38 }
 0x7b6   :  { %3224 = vmatprep.subr.mxu0 %v3407_v54  ;;  %3229 = vmatprep.subr.mxu1 %v3407_v54 }
 0x7b7   :  { %3225 = vmatpush3.msra.mxu0 %v1878_v49  ;;  %3230 = vmatpush3.msra.mxu1 %v1879_v55 }
 0x7b8   :  { %3226 = vmatprep.mubr.msk.f32.mxu0 %vm3408_vm5, %v3407_v54  ;;  %3231 = vmatprep.mubr.msk.f32.mxu1 %vm3408_vm5, %v3407_v54 }
 0x7b9   :  { %3227 = vmatmul.mubr.msk.f32.vlgmr.msra.gmra.mrb[12].mxu0 %vm636_vm6, %v2234_v52  ;;  %3232 = vmatmul.mubr.msk.f32.vlgmr.msra.gmra.mrb[18].mxu1 %vm636_vm6, %v2235_v58  ;;  %v3377_v58 = vld [vmem:[%s3973_s0 + $0x8] sm:$0xff] }
 0x7ba   :  { %3242 = vmatprep.mubr.msk.f32.mxu0 %vm48_vm0, %v1437_v44  ;;  %3284 = vmatprep.subr.bf16.mxu0 %v3283_v21  ;;  %v3378_v44 = vld [vmem:[%s3973_s0] sm:$0xff] }
 0x7bb   :  { %3286 = vmatpush3.bf16.msra.mxu0 %v3283_v21 }
 0x7bc   :  { %3288 = vmatprep.subr.bf16.mxu0 %v3287_v16 }
 0x7bf   :  { %3290 = vmatpush3.bf16.msra.mxu0 %v3287_v16 }
 0x888   :  { %v2305_v54 = vpop.f32.mrb[10].mxu0  ;;  %v2378_v46 = vpop.f32.mrb[16].mxu1 }
 0x889   :  { %v3218_v50 = vpop.f32.mrb[11].mxu0  ;;  %v3223_v57 = vpop.f32.mrb[17].mxu1 }
 0x88c   :  { %v2451_v59 = vpop.f32.mrb[12].mxu0  ;;  %v2524_v36 = vpop.f32.mrb[18].mxu1 }
 0x88d   :  { %v2528_v37 = vcombine.low %v2305_v54, %v2451_v59  ;;  %v2529_v8 = vcombine.high %v2305_v54, %v2451_v59  ;;  %v2544_v42 = vcombine.low %v2378_v46, %v2524_v36  ;;  %v2545_v45 = vcombine.high %v2378_v46, %v2524_v36  ;;  %v3228_v60 = vpop.f32.mrb[13].mxu0  ;;  %v3233_v61 = vpop.f32.mrb[19].mxu1 }
 0x88e   :  { %v2822_v60 = vld [vmem:[%s3978_s5] sm:$0xff]  ;;  %v2823_v61 = vld [vmem:[%s3978_s5 + $0x8] sm:$0xff] }
 0x88f   :  { %v2536_v62 = vrot.slane %v2528_v37, %v3534_v0  ;;  %v2543_v51 = vrot.slane %v2529_v8, %v3534_v0  ;;  %v2552_v63 = vrot.slane %v2544_v42, %v3534_v0  ;;  %v2559_v1 = vrot.slane %v2545_v45, %v3534_v0 }
 0x891   :  { %v2560_v2 = vcombine.low %v2536_v62, %v2552_v63  ;;  %v2561_v3 = vcombine.high %v2536_v62, %v2552_v63  ;;  %v2576_v4 = vcombine.low %v2543_v51, %v2559_v1  ;;  %v2577_v5 = vcombine.high %v2543_v51, %v2559_v1  ;;  %v2824_v62 = vld [vmem:[%s3978_s5 + $0x10] sm:$0xff]  ;;  %v2825_v63 = vld [vmem:[%s3978_s5 + $0x18] sm:$0xff] }
 0x892   :  { %v3291_v51 = vpack.c.bf16 %v2823_v61, %v2822_v60  ;;  %v3295_v1 = vpack.c.bf16 %v2825_v63, %v2824_v62 }
 0x893   :  { %v2568_v12 = vrot.slane %v2560_v2, %v3544_v9  ;;  %v2575_v13 = vrot.slane %v2561_v3, %v3544_v9  ;;  %v2584_v14 = vrot.slane %v2576_v4, %v3544_v9  ;;  %v2591_v15 = vrot.slane %v2577_v5, %v3544_v9  ;;  %v2913_v2 = vld [vmem:[%s3979_s6] sm:$0xff]  ;;  %v2914_v3 = vld [vmem:[%s3979_s6 + $0x8] sm:$0xff]  ;;  %v2915_v4 = vld [vmem:[%s3979_s6 + $0x10] sm:$0xff] }
 0x894   :  { %3292 = vmatprep.subr.bf16.mxu1 %v3291_v51  ;;  %v3299_v5 = vpack.c.bf16 %v2914_v3, %v2913_v2  ;;  %v3303_v7 = vpack.c.bf16 %v2916_v6, %v2915_v4 }
 0x895   :  { %v2596_v17 = vcombine.low %v2568_v12, %v2575_v13  ;;  %v3070_v18 = vcombine.high %v2568_v12, %v2575_v13  ;;  %v2612_v19 = vcombine.low %v2584_v14, %v2591_v15  ;;  %v3071_v20 = vcombine.high %v2584_v14, %v2591_v15  ;;  %3294 = vmatpush3.bf16.msra.mxu1 %v3291_v51  ;;  %v2917_v12 = vld [vmem:[%s3979_s6 + $0x20] sm:$0xff]  ;;  %v2918_v13 = vld [vmem:[%s3979_s6 + $0x28] sm:$0xff] }
 0x896   :  { %3296 = vmatprep.subr.bf16.mxu1 %v3295_v1  ;;  %3300 = vmatprep.subr.bf16.mxu0 %v3299_v5  ;;  %v3307_v14 = vpack.c.bf16 %v2918_v13, %v2917_v12 }
 0x897   :  { %v2603_v22 = vrot.slane %v2596_v17, %v3534_v0  ;;  %v2611_v23 = vrot.slane %v3070_v18, %v3534_v0  ;;  %v2619_v24 = vrot.slane %v2612_v19, %v3534_v0  ;;  %v2627_v25 = vrot.slane %v3071_v20, %v3534_v0 }
 0x899   :  { %v2629_v26 = vcombine.high %v2603_v22, %v2611_v23  ;;  %v2645_v27 = vcombine.high %v2619_v24, %v2627_v25  ;;  %v2628_v28 = vcombine.low %v2603_v22, %v2611_v23  ;;  %v2644_v29 = vcombine.low %v2619_v24, %v2627_v25  ;;  %3298 = vmatpush3.bf16.msra.mxu1 %v3295_v1 }
 0x89b   :  { %v2643_v30 = vrot.slane %v2629_v26, %v3544_v9  ;;  %v2659_v31 = vrot.slane %v2645_v27, %v3544_v9  ;;  %v2636_v32 = vrot.slane %v2628_v28, %v3544_v9  ;;  %v2652_v33 = vrot.slane %v2644_v29, %v3544_v9  ;;  %v3072_v9 = vld [vmem:[%s3981_s8 + $0x1] ss:$0 sm:$0xff] }
 0x89d   :  { %v2663_v34 = vcombine.high %v2643_v30, %v2659_v31  ;;  %v2661_v35 = vcombine.high %v2636_v32, %v2652_v33  ;;  %v2662_v39 = vcombine.low %v2643_v30, %v2659_v31  ;;  %v2660_v40 = vcombine.low %v2636_v32, %v2652_v33  ;;  %v3075_v32 = vld [vmem:[%s3980_s7 + $0x2] ss:$0 sm:$0xff] }
 0x89f   :  { %2673 = vrot.lane.b32.xlu1 %v2663_v34, %s3414_s14  ;;  %2665 = vrot.lane.b32.xlu0 %v2661_v35, %s3412_s1  ;;  %v3076_v35 = vld [vmem:[%s3980_s7 + $0x3] ss:$0 sm:$0xff] }
 0x8a3   :  { %2669 = vrot.lane.b32.xlu0 %v2662_v39, %s3413_s13 }
 0x911   :  { %v2666_v0 = vpop.permute.xlu0 %2665  ;;  %v2674_v53 = vpop.permute.xlu1 %2673 }
 0x912   :  { %v2676_v41 = vsel %vm636_vm6, %v2660_v40, %v2666_v0 }
 0x915   :  { %v2670_v38 = vpop.permute.xlu0 %2669 }
 0x916   :  { %v2677_v47 = vsel %vm1434_vm9, %v2676_v41, %v2670_v38 }
 0x917   :  { %v2678_v49 = vsel %vm1436_vm10, %v2677_v47, %v2674_v53  ;;  %v2919_v47 = vld [vmem:[%s3979_s6 + $0x30] sm:$0xff] }
 0x918   :  { %3243 = vmatmul.mubr.msk.f32.vlgmr.msra.gmra.mrb[14].mxu0 %vm48_vm0, %v2678_v49  ;;  %v2920_v49 = vld [vmem:[%s3979_s6 + $0x38] sm:$0xff]  ;;  %s3415_s6 = smov [#allocation2]  }
 0x919   :  { %3302 = vmatpush3.bf16.msra.mxu0 %v3299_v5  ;;  %s3016_s30 = sshll.u32 %s3415_s6, 4  ;;  %s3017_s30 = int_to_ptr.vmem [resolvable:$true] %s3016_s30 }
 0x91a   :  { %3304 = vmatprep.subr.bf16.mxu0 %v3303_v7  ;;  %s3379_s10 = scalar_lea.vmem %s3017_s30, 256  ;;  %p3384_p1 = scmp.lt.s32.totalorder %s3017_s30, %s3017_s30 }
 0x91b   :  { %p3380_p0 = scmp.ne.s32.totalorder %s3017_s30, %s3379_s10  ;;  %p3385_p2 = scmp.lt.s32.totalorder %s3379_s10, %s3379_s10 }
 0x91d   :  { %3306 = vmatpush3.bf16.msra.mxu0 %v3303_v7  ;;  %p3386_p3 = por %p3385_p2, %p3384_p1 }
 0x91e   :  { %3308 = vmatprep.subr.bf16.mxu0 %v3307_v14 }
 0x91f   :  { %p3387_p4 = pnand %p3386_p3, %p3380_p0 }
 0x921   :  { %3310 = vmatpush3.bf16.msra.mxu0 %v3307_v14 }
 0x9eb   :  { %v3244_v55 = vpop.f32.mrb[14].mxu0 }
 0x9ec   :  { %v2765_v56 = vadd.f32 %v3244_v55, %v3072_v9  ;;  %v2759_v52 = vpop.f32.mrb[15].mxu0  ;;  %v3077_v55 = vld [vmem:[%s3981_s8] ss:$0 sm:$0xff] }
 0x9ed   :  { %v2760_v43 = vadd.f32 %v3072_v9, %v2759_v52  ;;  %v3311_v9 = vpack.c.bf16 %v2920_v49, %v2919_v47 }
 0x9ee   :  { %v3886_v48 = vadd.f32 %v3377_v58, %v2765_v56 }
 0x9ef   :  { %v3891_v10 = vadd.f32 %v3378_v44, %v2760_v43  ;;  %3312 = vmatprep.subr.bf16.mxu0 %v3311_v9 }
 0x9f0   :  { %v2773_v11 = vsel %vm48_vm0, %v3886_v48, 0.0  ;;  %3314 = vmatpush3.bf16.msra.mxu0 %v3311_v9 }
 0x9f1   :  { %2774 = vadd.xlane.f32.xlu1 %v2773_v11  ;;  %v2770_v21 = vsel %vm48_vm0, %v3891_v10, 0.0 }
 0x9f2   :  { %2771 = vadd.xlane.f32.xlu0 %v2770_v21  ;;  %v3080_v21 = vld [vmem:[%s3981_s8 + $0x2] ss:$0 sm:$0xff] }
 0xa7e   :  { %v2775_v54 = vpop.xlane.xlu1 %2774 }
 0xa7f   :  { %v2777_v46 = vmul.f32 0.03125, %v2775_v54  ;;  %v2772_v50 = vpop.xlane.xlu0 %2771 }
 0xa80   :  { %v2776_v57 = vmul.f32 0.03125, %v2772_v50 }
 0xa81   :  { %v3898_v59 = vsub.f32 %v3886_v48, %v2777_v46 }
 0xa82   :  { %v2778_v36 = vsub.f32 %v3891_v10, %v2776_v57 }
 0xa83   :  { %v2781_v42 = vmul.f32 %v3898_v59, %v3898_v59 }
 0xa84   :  { %v2780_v37 = vmul.f32 %v2778_v36, %v2778_v36 }
 0xa85   :  { %v2785_v45 = vsel %vm48_vm0, %v2781_v42, 0.0 }
 0xa86   :  { %v2782_v8 = vsel %vm48_vm0, %v2780_v37, 0.0 }
 0xa87   :  { %2783 = vadd.xlane.f32.xlu0 %v2782_v8 }
 0xa8b   :  { %2786 = vadd.xlane.f32.xlu0 %v2785_v45 }
 0xb14   :  { %v2784_v15 = vpop.xlane.xlu0 %2783 }
 0xb15   :  { %v2788_v16 = vmul.f32 0.032258064, %v2784_v15 }
 0xb17   :  { %3369 = vrsqrt.f32 %v2788_v16  ;;  %vm2792_vm11 = vcmp.eq.f32.partialorder %v2788_v16, inf  ;;  %v2795_v22 = vand.u32 2147483648, %v2788_v16  ;;  %vm2794_vm12 = vcmp.eq.f32.partialorder %v2788_v16, 0.0 }
 0xb18   :  { %v2787_v17 = vpop.xlane.xlu0 %2786 }
 0xb19   :  { %v2789_v18 = vmul.f32 0.032258064, %v2787_v17 }
 0xb1b   :  { %3371 = vrsqrt.f32 %v2789_v18  ;;  %vm2799_vm13 = vcmp.eq.f32.partialorder %v2789_v18, inf  ;;  %v2802_v28 = vand.u32 2147483648, %v2789_v18  ;;  %vm2801_vm14 = vcmp.eq.f32.partialorder %v2789_v18, 0.0 }
 0xb21   :  { %v3370_v19 = vpop.eup %3369 }
 0xb22   :  { %v2791_v20 = vmul.f32 %v3370_v19, %v2788_v16 }
 0xb24   :  { %v2793_v23 = vsel %vm2792_vm11, %v2788_v16, %v2791_v20 }
 0xb25   :  { %v3372_v24 = vpop.eup %3371  ;;  %v2796_v25 = vsel %vm2794_vm12, %v2795_v22, %v2793_v23 }
 0xb26   :  { %v2804_v26 = vadd.f32 1e-06, %v2796_v25  ;;  %v2798_v27 = vmul.f32 %v3372_v24, %v2789_v18 }
 0xb28   :  { %3373 = vrcp.f32 %v2804_v26  ;;  %v2800_v29 = vsel %vm2799_vm13, %v2789_v18, %v2798_v27 }
 0xb29   :  { %v2803_v30 = vsel %vm2801_vm14, %v2802_v28, %v2800_v29 }
 0xb2a   :  { %v2805_v31 = vadd.f32 1e-06, %v2803_v30 }
 0xb2c   :  { %3375 = vrcp.f32 %v2805_v31 }
 0xb32   :  { %v3374_v33 = vpop.eup %3373 }
 0xb33   :  { %v2812_v34 = vmul.f32 %v3374_v33, %v3075_v32 }
 0xb35   :  { %v2814_v39 = vmul.f32 %v2812_v34, %v2778_v36 }
 0xb36   :  { %v3376_v40 = vpop.eup %3375 }
 0xb37   :  { %v2813_v0 = vmul.f32 %v3376_v40, %v3075_v32  ;;  %v2820_v41 = vadd.f32 %v3076_v35, %v2814_v39 }
 0xb39   :  { %v2815_v38 = vmul.f32 %v2813_v0, %v3898_v59  ;;  %3253 = vmatprep.mubr.msk.f32.mxu1 %vm48_vm0, %v2820_v41 }
 0xb3b   :  { %v2821_v53 = vadd.f32 %v3076_v35, %v2815_v38 }
 0xb3d   :  { %3254 = vmatmul.mubr.msk.f32.vlgmr.msra.gmra.mrb[20].mxu1 %vm48_vm0, %v2821_v53 }
 0xc10   :  { %v3255_v56 = vpop.f32.mrb[20].mxu1 }
 0xc11   :  { %v2908_v52 = vadd.f32 %v3255_v56, %v3077_v55  ;;  %v2902_v43 = vpop.f32.mrb[21].mxu1 }
 0xc12   :  { %v2903_v58 = vadd.f32 %v3077_v55, %v2902_v43 }
 0xc13   :  { %v2912_v11 = vmax.f32 %v2908_v52, 0.0 }
 0xc14   :  { %v2911_v44 = vmax.f32 %v2903_v58, 0.0 }
 0xc16   :  { %3272 = vmatprep.mubr.msk.f32.mxu0 %vm2925_vm15, %v2911_v44 }
 0xc17   :  { %3273 = vmatmul.mubr.msk.f32.vlgmr.msra.gmra.mrb[16].mxu0 %vm2925_vm15, %v2912_v11 }
 0xcea   :  { %v3274_v54 = vpop.f32.mrb[16].mxu0 }
 0xceb   :  { %v3004_v46 = vadd.f32 %v3274_v54, %v3080_v21  ;;  %v2998_v50 = vpop.f32.mrb[17].mxu0 }
 0xcec   :  { %v2999_v57 = vadd.f32 %v3080_v21, %v2998_v50 }
 0xced   :  { %v3008_v59 = vadd.f32 %v3004_v46, %v3886_v48 }
 0xcee   :  { %v3007_v36 = vadd.f32 %v2999_v57, %v3891_v10 }
 0xcef   :  { %3010 = vst.msk [vmem:[#allocation2 + $0x8] sm:$0xff] %vm48_vm0, %v3008_v59 }
 0xcf0   :  { %3009 = vst.msk [vmem:[#allocation2] sm:$0xff] %vm48_vm0, %v3007_v36 }
 0xcf1   :  { %3390 = shalt.err (!%p3387_p4)
}
 0xcf2   :  { %s3391_s12 = scalar_lea.hbm %s3982_s9, 256 }
 0xcf3   :  { %p3392_p5 = scmp.ne.s32.totalorder %s3982_s9, %s3391_s12  ;;  %p3395_p6 = scmp.lt.u32.totalorder %s3391_s12, %s3982_s9 }
 0xcf5   :  { %p3397_p7 = pnand %p3395_p6, %p3392_p5 }
 0xcf7   :  { %3400 = shalt.err (!%p3397_p7)
}
 0xcf8   :  { %s3416_s17 = smov 128  }
 0xcf9   :  { %3022 = dma.vmem_to_hbm [thread:$0]  %s3017_s30, 256, %s3982_s9, [#allocation3], %s3416_s17, %s3416_s17, %s3412_s1  }
 0xcfa   :  { %3401 = dma.done.wait [#allocation3], 256  }
 0xcfb   :  { %3402 = vsyncadd [#allocation3], 4294967040 }
 0xcfc   :  { %3026 = vsyncpa [#allocation3], 1 }

</bundles_post_ra>
